<compile_context>
chip_gen: v7x
topology: tpu7x:2x2x1
jax: 0.10.0
libtpu: 0.0.40
codegen_flags: <defaults>
</compile_context>

<pallas_src>
import functools

import jax
import jax.numpy as jnp
from jax.experimental import pallas as pl
from jax.experimental.pallas import tpu as pltpu


def _round128(n):
    return ((n + 127) // 128) * 128


def lck_kernel(x_ref, w1_ref, b1_ref, w2_ref, b2_ref,
               wsa_ref, bsa_ref, wsb_ref, bsb_ref,
               out_ref, pad_ref, *, H, W):
    C = x_ref.shape[0]
    HW = H * W
    R = pad_ref.shape[0]                      # max(C, 2)
    P = (pad_ref.shape[1] - HW) // 2          # halo width (multiple of 128)
    f32 = jnp.float32

    # column index of every flattened position (edge masks for kw taps)
    col = jax.lax.broadcasted_iota(jnp.int32, (1, HW), 1) % W

    def col_mask(d):
        if d == 0:
            return None
        if d < 0:
            return col >= -d
        return col < W - d

    # Zero only the halos; interiors are fully overwritten before every read
    # and halos are never written afterwards, so they stay zero for all four
    # convs.  Re-zeroed every grid step so megacore sharding of the batch axis
    # stays correct (scratch is per-core and uninitialized).
    pad_ref[:, :P] = jnp.zeros((R, P), f32)
    pad_ref[:, P + HW:] = jnp.zeros((R, P), f32)

    x = x_ref[...].astype(f32)                     # (C, HW)

    # ---- att_conv1: depthwise 5x5, padding 2 (grouped by kw offset) --------
    pad_ref[:C, P:P + HW] = x                      # lane-aligned interior store
    w1 = w1_ref[...]                               # (C, 25)
    acc1 = None
    for d in range(-2, 3):                         # kw offset
        grp = None
        for a in range(5):                         # kh index
            s = (a - 2) * W + d
            t = a * 5 + d + 2
            term = pad_ref[:C, P + s:P + s + HW] * w1[:, t:t + 1]
            grp = term if grp is None else grp + term
        m = col_mask(d)
        if m is not None:
            grp = jnp.where(m, grp, 0.0)
        acc1 = grp if acc1 is None else acc1 + grp
    att1 = acc1 + b1_ref[...]                      # (C, HW)

    # ---- att_conv2: depthwise (7,1), dilation 3, padding (9,0) -------------
    pad_ref[:C, P:P + HW] = att1
    w2 = w2_ref[...]                               # (C, 7)
    acc2 = None
    for a in range(7):
        s = (3 * a - 9) * W
        term = pad_ref[:C, P + s:P + s + HW] * w2[:, a:a + 1]
        acc2 = term if acc2 is None else acc2 + term
    att2 = acc2 + b2_ref[...]

    # ---- channel mean / max over cat([att1, att2], channel dim) ------------
    avg_att = (jnp.sum(att1, axis=0, keepdims=True) +
               jnp.sum(att2, axis=0, keepdims=True)) * (1.0 / (2 * C))
    max_att = jnp.maximum(jnp.max(att1, axis=0, keepdims=True),
                          jnp.max(att2, axis=0, keepdims=True))
    se_in = jnp.concatenate([avg_att, max_att], axis=0)       # (2, HW)

    # ---- spatial_se[0]: depthwise(2) (1,11), padding (0,5) -----------------
    pad_ref[0:2, P:P + HW] = se_in
    wsa = wsa_ref[...]                             # (2, 11)
    acc_a = None
    for d in range(-5, 6):
        term = pad_ref[0:2, P + d:P + d + HW] * wsa[:, d + 5:d + 6]
        m = col_mask(d)
        if m is not None:
            term = jnp.where(m, term, 0.0)
        acc_a = term if acc_a is None else acc_a + term
    se_a = acc_a + bsa_ref[...]

    # ---- spatial_se[1]: depthwise(2) (11,1), padding (5,0), sigmoid --------
    pad_ref[0:2, P:P + HW] = se_a
    wsb = wsb_ref[...]                             # (2, 11)
    acc_b = None
    for a in range(11):
        s = (a - 5) * W
        term = pad_ref[0:2, P + s:P + s + HW] * wsb[:, a:a + 1]
        acc_b = term if acc_b is None else acc_b + term
    se = jax.nn.sigmoid(acc_b + bsb_ref[...])      # (2, HW)

    # ---- attention-weighted sum + residual ----------------------------------
    out = att1 * se[0:1, :] + att2 * se[1:2, :] + x
    out_ref[...] = out.astype(out_ref.dtype)


def init_params(key, dim):
    ks = jax.random.split(key, 8)
    s = 0.1
    return dict(
        w1=s * jax.random.normal(ks[0], (dim, 25), jnp.float32),   # 5x5 depthwise
        b1=s * jax.random.normal(ks[1], (dim, 1), jnp.float32),
        w2=s * jax.random.normal(ks[2], (dim, 7), jnp.float32),    # (7,1) dil 3
        b2=s * jax.random.normal(ks[3], (dim, 1), jnp.float32),
        wsa=s * jax.random.normal(ks[4], (2, 11), jnp.float32),    # (1,11)
        bsa=s * jax.random.normal(ks[5], (2, 1), jnp.float32),
        wsb=s * jax.random.normal(ks[6], (2, 11), jnp.float32),    # (11,1)
        bsb=s * jax.random.normal(ks[7], (2, 1), jnp.float32),
    )


@jax.jit
def lck_forward(x, params):
    N, C, H, W = x.shape
    HW = H * W
    # Single halo wide enough for the largest flat shift (9*W from the
    # dilation-3 (7,1) conv), rounded to a multiple of 128 so the interior
    # store is lane-aligned.
    P = _round128(9 * W)
    R = max(C, 2)

    x_flat = x.reshape(N, C, HW)                   # free reshape (contiguous)
    kern = functools.partial(lck_kernel, H=H, W=W)
    const = lambda b: (0, 0)

    out_flat = pl.pallas_call(
        kern,
        out_shape=jax.ShapeDtypeStruct((N, C, HW), x.dtype),
        grid_spec=pltpu.PrefetchScalarGridSpec(
            num_scalar_prefetch=0,
            grid=(N,),
            in_specs=[
                pl.BlockSpec((None, C, HW), lambda b: (b, 0, 0)),
                pl.BlockSpec((C, 25), const),
                pl.BlockSpec((C, 1), const),
                pl.BlockSpec((C, 7), const),
                pl.BlockSpec((C, 1), const),
                pl.BlockSpec((2, 11), const),
                pl.BlockSpec((2, 1), const),
                pl.BlockSpec((2, 11), const),
                pl.BlockSpec((2, 1), const),
            ],
            out_specs=pl.BlockSpec((None, C, HW), lambda b: (b, 0, 0)),
            scratch_shapes=[
                pltpu.VMEM((R, 2 * P + HW), jnp.float32),   # shared halo buffer
            ]),
        compiler_params=pltpu.CompilerParams(
            dimension_semantics=("parallel",),
            vmem_limit_bytes=32 * 1024 * 1024),
    )(x_flat, params["w1"], params["b1"], params["w2"], params["b2"],
      params["wsa"], params["bsa"], params["wsb"], params["bsb"])
    return out_flat.reshape(N, C, H, W)


# ------------------------- pure-JAX reference ------------------------------
def _dwconv_ref(x, w, b, pad, dil):
    # x: (N, C, H, W); w: (C, 1, kh, kw); depthwise (feature_group_count = C)
    C = x.shape[1]
    y = jax.lax.conv_general_dilated(
        x, w, window_strides=(1, 1), padding=pad, rhs_dilation=dil,
        dimension_numbers=("NCHW", "OIHW", "NCHW"), feature_group_count=C)
    return y + b.reshape(1, C, 1, 1)


def lck_reference(x, params):
    N, C, H, W = x.shape
    att1 = _dwconv_ref(x, params["w1"].reshape(C, 1, 5, 5), params["b1"][:, 0],
                       ((2, 2), (2, 2)), (1, 1))
    att2 = _dwconv_ref(att1, params["w2"].reshape(C, 1, 7, 1), params["b2"][:, 0],
                       ((9, 9), (0, 0)), (3, 1))
    att = jnp.concatenate([att1, att2], axis=1)
    avg_att = jnp.mean(att, axis=1, keepdims=True)
    max_att = jnp.max(att, axis=1, keepdims=True)
    se = jnp.concatenate([avg_att, max_att], axis=1)           # (N, 2, H, W)
    se = _dwconv_ref(se, params["wsa"].reshape(2, 1, 1, 11), params["bsa"][:, 0],
                     ((0, 0), (5, 5)), (1, 1))
    se = _dwconv_ref(se, params["wsb"].reshape(2, 1, 11, 1), params["bsb"][:, 0],
                     ((5, 5), (0, 0)), (1, 1))
    se = jax.nn.sigmoid(se)
    return att1 * se[:, 0:1] + att2 * se[:, 1:2] + x


if __name__ == "__main__":
    key = jax.random.PRNGKey(0)
    kx, kp = jax.random.split(key)
    N, C, H, W = 2, 8, 16, 16                 # dim = 8
    x = jax.random.normal(kx, (N, C, H, W), jnp.float32)
    params = init_params(kp, C)

    out = lck_forward(x, params)
    out = jax.block_until_ready(out)

    ref = lck_reference(x, params)
    assert out.shape == ref.shape and out.dtype == ref.dtype
    max_err = float(jnp.max(jnp.abs(out - ref)))
    if max_err > 1e-3:
        raise AssertionError(f"mismatch vs reference: max_err={max_err}")
    print("KERNEL_OK")
</pallas_src>

<mosaic_0001>
module attributes {stable_mosaic.version = 11 : i64} {
  func.func @lck_kernel(%arg0: i32, %arg1: memref<1x8x256xf32, #tpu.memory_space<vmem>>, %arg2: memref<8x25xf32, #tpu.memory_space<vmem>>, %arg3: memref<8x1xf32, #tpu.memory_space<vmem>>, %arg4: memref<8x7xf32, #tpu.memory_space<vmem>>, %arg5: memref<8x1xf32, #tpu.memory_space<vmem>>, %arg6: memref<2x11xf32, #tpu.memory_space<vmem>>, %arg7: memref<2x1xf32, #tpu.memory_space<vmem>>, %arg8: memref<2x11xf32, #tpu.memory_space<vmem>>, %arg9: memref<2x1xf32, #tpu.memory_space<vmem>>, %arg10: memref<1x8x256xf32, #tpu.memory_space<vmem>>, %arg11: memref<8x768xf32, #tpu.memory_space<vmem>>) attributes {dimension_semantics = [#tpu.dimension_semantics<parallel>], iteration_bounds = array<i64: 2>, scalar_prefetch = 0 : i64, scratch_operands = 1 : i64, tpu.core_type = #tpu.core_type<tc>, window_params = [{transform_indices = @transform_0, window_bounds = array<i64: 1, 8, 256>}, {pipeline_mode = #tpu.pipeline_mode<synchronous>, transform_indices = @transform_1, window_bounds = array<i64: 8, 25>}, {pipeline_mode = #tpu.pipeline_mode<synchronous>, transform_indices = @transform_2, window_bounds = array<i64: 8, 1>}, {pipeline_mode = #tpu.pipeline_mode<synchronous>, transform_indices = @transform_3, window_bounds = array<i64: 8, 7>}, {pipeline_mode = #tpu.pipeline_mode<synchronous>, transform_indices = @transform_4, window_bounds = array<i64: 8, 1>}, {pipeline_mode = #tpu.pipeline_mode<synchronous>, transform_indices = @transform_5, window_bounds = array<i64: 2, 11>}, {pipeline_mode = #tpu.pipeline_mode<synchronous>, transform_indices = @transform_6, window_bounds = array<i64: 2, 1>}, {pipeline_mode = #tpu.pipeline_mode<synchronous>, transform_indices = @transform_7, window_bounds = array<i64: 2, 11>}, {pipeline_mode = #tpu.pipeline_mode<synchronous>, transform_indices = @transform_8, window_bounds = array<i64: 2, 1>}, {transform_indices = @transform_9, window_bounds = array<i64: 1, 8, 256>}]} {
    %0 = tpu.iota {dimensions = array<i32: 1>} : vector<1x256xi32>
    %c16_i32 = arith.constant 16 : i32
    %c0_i32 = arith.constant 0 : i32
    %1 = arith.cmpi eq, %c16_i32, %c0_i32 : i32
    %c1_i32 = arith.constant 1 : i32
    %2 = arith.select %1, %c1_i32, %c16_i32 : i32
    %3 = vector.broadcast %2 : i32 to vector<1x256xi32>
    %4 = arith.remsi %0, %3 : vector<1x256xi32>
    %c0_i32_0 = arith.constant 0 : i32
    %5 = vector.broadcast %c0_i32_0 : i32 to vector<1x256xi32>
    %6 = arith.cmpi ne, %4, %5 : vector<1x256xi32>
    %c0_i32_1 = arith.constant 0 : i32
    %7 = vector.broadcast %c0_i32_1 : i32 to vector<1x256xi32>
    %8 = arith.cmpi slt, %4, %7 : vector<1x256xi32>
    %c0_i32_2 = arith.constant 0 : i32
    %9 = arith.cmpi slt, %2, %c0_i32_2 : i32
    %10 = vector.broadcast %9 : i1 to vector<1x256xi1>
    %11 = vector.broadcast %10 : vector<1x256xi1> to vector<1x256xi1>
    %12 = arith.xori %8, %11 : vector<1x256xi1>
    %13 = arith.andi %12, %6 : vector<1x256xi1>
    %14 = vector.broadcast %2 : i32 to vector<1x256xi32>
    %15 = arith.addi %4, %14 : vector<1x256xi32>
    %16 = arith.select %13, %15, %4 : vector<1x256xi1>, vector<1x256xi32>
    %cst = arith.constant 0.000000e+00 : f32
    %17 = vector.broadcast %cst : f32 to vector<8x256xf32>
    %c0 = arith.constant 0 : index
    %c0_3 = arith.constant 0 : index
    %18 = vector.load %arg11[%c0, %c0_3] : memref<8x768xf32, #tpu.memory_space<vmem>>, vector<8x256xf32>
    tpu.vector_store %arg11[%c0, %c0_3], %17 {strides = array<i32>} : memref<8x768xf32, #tpu.memory_space<vmem>>, vector<8x256xf32>,
    %cst_4 = arith.constant 0.000000e+00 : f32
    %19 = vector.broadcast %cst_4 : f32 to vector<8x256xf32>
    %c0_5 = arith.constant 0 : index
    %c512 = arith.constant 512 : index
    %20 = vector.load %arg11[%c0_5, %c512] : memref<8x768xf32, #tpu.memory_space<vmem>>, vector<8x256xf32>
    tpu.vector_store %arg11[%c0_5, %c512], %19 {strides = array<i32>} : memref<8x768xf32, #tpu.memory_space<vmem>>, vector<8x256xf32>,
    %c0_6 = arith.constant 0 : index
    %c0_7 = arith.constant 0 : index
    %c0_8 = arith.constant 0 : index
    %21 = vector.load %arg1[%c0_6, %c0_7, %c0_8] : memref<1x8x256xf32, #tpu.memory_space<vmem>>, vector<1x8x256xf32>
    %22 = vector.shape_cast %21 : vector<1x8x256xf32> to vector<8x256xf32>
    %c0_9 = arith.constant 0 : index
    %c256 = arith.constant 256 : index
    %23 = vector.load %arg11[%c0_9, %c256] : memref<8x768xf32, #tpu.memory_space<vmem>>, vector<8x256xf32>
    tpu.vector_store %arg11[%c0_9, %c256], %22 {strides = array<i32>} : memref<8x768xf32, #tpu.memory_space<vmem>>, vector<8x256xf32>,
    %c0_10 = arith.constant 0 : index
    %c0_11 = arith.constant 0 : index
    %24 = vector.load %arg2[%c0_10, %c0_11] : memref<8x25xf32, #tpu.memory_space<vmem>>, vector<8x25xf32>
    %c0_12 = arith.constant 0 : index
    %c222 = arith.constant 222 : index
    %25 = vector.load %arg11[%c0_12, %c222] : memref<8x768xf32, #tpu.memory_space<vmem>>, vector<8x256xf32>
    %26 = vector.extract_strided_slice %24 {offsets = [0, 0], sizes = [8, 1], strides = [1, 1]} : vector<8x25xf32> to vector<8x1xf32>
    %27 = vector.broadcast %26 : vector<8x1xf32> to vector<8x256xf32>
    %28 = arith.mulf %25, %27 : vector<8x256xf32>
    %c0_13 = arith.constant 0 : index
    %c238 = arith.constant 238 : index
    %29 = vector.load %arg11[%c0_13, %c238] : memref<8x768xf32, #tpu.memory_space<vmem>>, vector<8x256xf32>
    %30 = vector.extract_strided_slice %24 {offsets = [0, 5], sizes = [8, 1], strides = [1, 1]} : vector<8x25xf32> to vector<8x1xf32>
    %31 = vector.broadcast %30 : vector<8x1xf32> to vector<8x256xf32>
    %32 = arith.mulf %29, %31 : vector<8x256xf32>
    %33 = arith.addf %28, %32 : vector<8x256xf32>
    %c0_14 = arith.constant 0 : index
    %c254 = arith.constant 254 : index
    %34 = vector.load %arg11[%c0_14, %c254] : memref<8x768xf32, #tpu.memory_space<vmem>>, vector<8x256xf32>
    %35 = vector.extract_strided_slice %24 {offsets = [0, 10], sizes = [8, 1], strides = [1, 1]} : vector<8x25xf32> to vector<8x1xf32>
    %36 = vector.broadcast %35 : vector<8x1xf32> to vector<8x256xf32>
    %37 = arith.mulf %34, %36 : vector<8x256xf32>
    %38 = arith.addf %33, %37 : vector<8x256xf32>
    %c0_15 = arith.constant 0 : index
    %c270 = arith.constant 270 : index
    %39 = vector.load %arg11[%c0_15, %c270] : memref<8x768xf32, #tpu.memory_space<vmem>>, vector<8x256xf32>
    %40 = vector.extract_strided_slice %24 {offsets = [0, 15], sizes = [8, 1], strides = [1, 1]} : vector<8x25xf32> to vector<8x1xf32>
    %41 = vector.broadcast %40 : vector<8x1xf32> to vector<8x256xf32>
    %42 = arith.mulf %39, %41 : vector<8x256xf32>
    %43 = arith.addf %38, %42 : vector<8x256xf32>
    %c0_16 = arith.constant 0 : index
    %c286 = arith.constant 286 : index
    %44 = vector.load %arg11[%c0_16, %c286] : memref<8x768xf32, #tpu.memory_space<vmem>>, vector<8x256xf32>
    %45 = vector.extract_strided_slice %24 {offsets = [0, 20], sizes = [8, 1], strides = [1, 1]} : vector<8x25xf32> to vector<8x1xf32>
    %46 = vector.broadcast %45 : vector<8x1xf32> to vector<8x256xf32>
    %47 = arith.mulf %44, %46 : vector<8x256xf32>
    %48 = arith.addf %43, %47 : vector<8x256xf32>
    %c2_i32 = arith.constant 2 : i32
    %49 = vector.broadcast %c2_i32 : i32 to vector<1x256xi32>
    %50 = arith.cmpi sge, %16, %49 : vector<1x256xi32>
    %cst_17 = arith.constant 0.000000e+00 : f32
    %51 = vector.shape_cast %50 : vector<1x256xi1> to vector<1x256xi1>
    %52 = vector.broadcast %51 : vector<1x256xi1> to vector<8x256xi1>
    %53 = vector.broadcast %cst_17 : f32 to vector<8x256xf32>
    %54 = arith.select %52, %48, %53 : vector<8x256xi1>, vector<8x256xf32>
    %c0_18 = arith.constant 0 : index
    %c223 = arith.constant 223 : index
    %55 = vector.load %arg11[%c0_18, %c223] : memref<8x768xf32, #tpu.memory_space<vmem>>, vector<8x256xf32>
    %56 = vector.extract_strided_slice %24 {offsets = [0, 1], sizes = [8, 1], strides = [1, 1]} : vector<8x25xf32> to vector<8x1xf32>
    %57 = vector.broadcast %56 : vector<8x1xf32> to vector<8x256xf32>
    %58 = arith.mulf %55, %57 : vector<8x256xf32>
    %c0_19 = arith.constant 0 : index
    %c239 = arith.constant 239 : index
    %59 = vector.load %arg11[%c0_19, %c239] : memref<8x768xf32, #tpu.memory_space<vmem>>, vector<8x256xf32>
    %60 = vector.extract_strided_slice %24 {offsets = [0, 6], sizes = [8, 1], strides = [1, 1]} : vector<8x25xf32> to vector<8x1xf32>
    %61 = vector.broadcast %60 : vector<8x1xf32> to vector<8x256xf32>
    %62 = arith.mulf %59, %61 : vector<8x256xf32>
    %63 = arith.addf %58, %62 : vector<8x256xf32>
    %c0_20 = arith.constant 0 : index
    %c255 = arith.constant 255 : index
    %64 = vector.load %arg11[%c0_20, %c255] : memref<8x768xf32, #tpu.memory_space<vmem>>, vector<8x256xf32>
    %65 = vector.extract_strided_slice %24 {offsets = [0, 11], sizes = [8, 1], strides = [1, 1]} : vector<8x25xf32> to vector<8x1xf32>
    %66 = vector.broadcast %65 : vector<8x1xf32> to vector<8x256xf32>
    %67 = arith.mulf %64, %66 : vector<8x256xf32>
    %68 = arith.addf %63, %67 : vector<8x256xf32>
    %c0_21 = arith.constant 0 : index
    %c271 = arith.constant 271 : index
    %69 = vector.load %arg11[%c0_21, %c271] : memref<8x768xf32, #tpu.memory_space<vmem>>, vector<8x256xf32>
    %70 = vector.extract_strided_slice %24 {offsets = [0, 16], sizes = [8, 1], strides = [1, 1]} : vector<8x25xf32> to vector<8x1xf32>
    %71 = vector.broadcast %70 : vector<8x1xf32> to vector<8x256xf32>
    %72 = arith.mulf %69, %71 : vector<8x256xf32>
    %73 = arith.addf %68, %72 : vector<8x256xf32>
    %c0_22 = arith.constant 0 : index
    %c287 = arith.constant 287 : index
    %74 = vector.load %arg11[%c0_22, %c287] : memref<8x768xf32, #tpu.memory_space<vmem>>, vector<8x256xf32>
    %75 = vector.extract_strided_slice %24 {offsets = [0, 21], sizes = [8, 1], strides = [1, 1]} : vector<8x25xf32> to vector<8x1xf32>
    %76 = vector.broadcast %75 : vector<8x1xf32> to vector<8x256xf32>
    %77 = arith.mulf %74, %76 : vector<8x256xf32>
    %78 = arith.addf %73, %77 : vector<8x256xf32>
    %c1_i32_23 = arith.constant 1 : i32
    %79 = vector.broadcast %c1_i32_23 : i32 to vector<1x256xi32>
    %80 = arith.cmpi sge, %16, %79 : vector<1x256xi32>
    %cst_24 = arith.constant 0.000000e+00 : f32
    %81 = vector.shape_cast %80 : vector<1x256xi1> to vector<1x256xi1>
    %82 = vector.broadcast %81 : vector<1x256xi1> to vector<8x256xi1>
    %83 = vector.broadcast %cst_24 : f32 to vector<8x256xf32>
    %84 = arith.select %82, %78, %83 : vector<8x256xi1>, vector<8x256xf32>
    %85 = arith.addf %54, %84 : vector<8x256xf32>
    %c0_25 = arith.constant 0 : index
    %c224 = arith.constant 224 : index
    %86 = vector.load %arg11[%c0_25, %c224] : memref<8x768xf32, #tpu.memory_space<vmem>>, vector<8x256xf32>
    %87 = vector.extract_strided_slice %24 {offsets = [0, 2], sizes = [8, 1], strides = [1, 1]} : vector<8x25xf32> to vector<8x1xf32>
    %88 = vector.broadcast %87 : vector<8x1xf32> to vector<8x256xf32>
    %89 = arith.mulf %86, %88 : vector<8x256xf32>
    %c0_26 = arith.constant 0 : index
    %c240 = arith.constant 240 : index
    %90 = vector.load %arg11[%c0_26, %c240] : memref<8x768xf32, #tpu.memory_space<vmem>>, vector<8x256xf32>
    %91 = vector.extract_strided_slice %24 {offsets = [0, 7], sizes = [8, 1], strides = [1, 1]} : vector<8x25xf32> to vector<8x1xf32>
    %92 = vector.broadcast %91 : vector<8x1xf32> to vector<8x256xf32>
    %93 = arith.mulf %90, %92 : vector<8x256xf32>
    %94 = arith.addf %89, %93 : vector<8x256xf32>
    %c0_27 = arith.constant 0 : index
    %c256_28 = arith.constant 256 : index
    %95 = vector.load %arg11[%c0_27, %c256_28] : memref<8x768xf32, #tpu.memory_space<vmem>>, vector<8x256xf32>
    %96 = vector.extract_strided_slice %24 {offsets = [0, 12], sizes = [8, 1], strides = [1, 1]} : vector<8x25xf32> to vector<8x1xf32>
    %97 = vector.broadcast %96 : vector<8x1xf32> to vector<8x256xf32>
    %98 = arith.mulf %95, %97 : vector<8x256xf32>
    %99 = arith.addf %94, %98 : vector<8x256xf32>
    %c0_29 = arith.constant 0 : index
    %c272 = arith.constant 272 : index
    %100 = vector.load %arg11[%c0_29, %c272] : memref<8x768xf32, #tpu.memory_space<vmem>>, vector<8x256xf32>
    %101 = vector.extract_strided_slice %24 {offsets = [0, 17], sizes = [8, 1], strides = [1, 1]} : vector<8x25xf32> to vector<8x1xf32>
    %102 = vector.broadcast %101 : vector<8x1xf32> to vector<8x256xf32>
    %103 = arith.mulf %100, %102 : vector<8x256xf32>
    %104 = arith.addf %99, %103 : vector<8x256xf32>
    %c0_30 = arith.constant 0 : index
    %c288 = arith.constant 288 : index
    %105 = vector.load %arg11[%c0_30, %c288] : memref<8x768xf32, #tpu.memory_space<vmem>>, vector<8x256xf32>
    %106 = vector.extract_strided_slice %24 {offsets = [0, 22], sizes = [8, 1], strides = [1, 1]} : vector<8x25xf32> to vector<8x1xf32>
    %107 = vector.broadcast %106 : vector<8x1xf32> to vector<8x256xf32>
    %108 = arith.mulf %105, %107 : vector<8x256xf32>
    %109 = arith.addf %104, %108 : vector<8x256xf32>
    %110 = arith.addf %85, %109 : vector<8x256xf32>
    %c0_31 = arith.constant 0 : index
    %c225 = arith.constant 225 : index
    %111 = vector.load %arg11[%c0_31, %c225] : memref<8x768xf32, #tpu.memory_space<vmem>>, vector<8x256xf32>
    %112 = vector.extract_strided_slice %24 {offsets = [0, 3], sizes = [8, 1], strides = [1, 1]} : vector<8x25xf32> to vector<8x1xf32>
    %113 = vector.broadcast %112 : vector<8x1xf32> to vector<8x256xf32>
    %114 = arith.mulf %111, %113 : vector<8x256xf32>
    %c0_32 = arith.constant 0 : index
    %c241 = arith.constant 241 : index
    %115 = vector.load %arg11[%c0_32, %c241] : memref<8x768xf32, #tpu.memory_space<vmem>>, vector<8x256xf32>
    %116 = vector.extract_strided_slice %24 {offsets = [0, 8], sizes = [8, 1], strides = [1, 1]} : vector<8x25xf32> to vector<8x1xf32>
    %117 = vector.broadcast %116 : vector<8x1xf32> to vector<8x256xf32>
    %118 = arith.mulf %115, %117 : vector<8x256xf32>
    %119 = arith.addf %114, %118 : vector<8x256xf32>
    %c0_33 = arith.constant 0 : index
    %c257 = arith.constant 257 : index
    %120 = vector.load %arg11[%c0_33, %c257] : memref<8x768xf32, #tpu.memory_space<vmem>>, vector<8x256xf32>
    %121 = vector.extract_strided_slice %24 {offsets = [0, 13], sizes = [8, 1], strides = [1, 1]} : vector<8x25xf32> to vector<8x1xf32>
    %122 = vector.broadcast %121 : vector<8x1xf32> to vector<8x256xf32>
    %123 = arith.mulf %120, %122 : vector<8x256xf32>
    %124 = arith.addf %119, %123 : vector<8x256xf32>
    %c0_34 = arith.constant 0 : index
    %c273 = arith.constant 273 : index
    %125 = vector.load %arg11[%c0_34, %c273] : memref<8x768xf32, #tpu.memory_space<vmem>>, vector<8x256xf32>
    %126 = vector.extract_strided_slice %24 {offsets = [0, 18], sizes = [8, 1], strides = [1, 1]} : vector<8x25xf32> to vector<8x1xf32>
    %127 = vector.broadcast %126 : vector<8x1xf32> to vector<8x256xf32>
    %128 = arith.mulf %125, %127 : vector<8x256xf32>
    %129 = arith.addf %124, %128 : vector<8x256xf32>
    %c0_35 = arith.constant 0 : index
    %c289 = arith.constant 289 : index
    %130 = vector.load %arg11[%c0_35, %c289] : memref<8x768xf32, #tpu.memory_space<vmem>>, vector<8x256xf32>
    %131 = vector.extract_strided_slice %24 {offsets = [0, 23], sizes = [8, 1], strides = [1, 1]} : vector<8x25xf32> to vector<8x1xf32>
    %132 = vector.broadcast %131 : vector<8x1xf32> to vector<8x256xf32>
    %133 = arith.mulf %130, %132 : vector<8x256xf32>
    %134 = arith.addf %129, %133 : vector<8x256xf32>
    %c15_i32 = arith.constant 15 : i32
    %135 = vector.broadcast %c15_i32 : i32 to vector<1x256xi32>
    %136 = arith.cmpi slt, %16, %135 : vector<1x256xi32>
    %cst_36 = arith.constant 0.000000e+00 : f32
    %137 = vector.shape_cast %136 : vector<1x256xi1> to vector<1x256xi1>
    %138 = vector.broadcast %137 : vector<1x256xi1> to vector<8x256xi1>
    %139 = vector.broadcast %cst_36 : f32 to vector<8x256xf32>
    %140 = arith.select %138, %134, %139 : vector<8x256xi1>, vector<8x256xf32>
    %141 = arith.addf %110, %140 : vector<8x256xf32>
    %c0_37 = arith.constant 0 : index
    %c226 = arith.constant 226 : index
    %142 = vector.load %arg11[%c0_37, %c226] : memref<8x768xf32, #tpu.memory_space<vmem>>, vector<8x256xf32>
    %143 = vector.extract_strided_slice %24 {offsets = [0, 4], sizes = [8, 1], strides = [1, 1]} : vector<8x25xf32> to vector<8x1xf32>
    %144 = vector.broadcast %143 : vector<8x1xf32> to vector<8x256xf32>
    %145 = arith.mulf %142, %144 : vector<8x256xf32>
    %c0_38 = arith.constant 0 : index
    %c242 = arith.constant 242 : index
    %146 = vector.load %arg11[%c0_38, %c242] : memref<8x768xf32, #tpu.memory_space<vmem>>, vector<8x256xf32>
    %147 = vector.extract_strided_slice %24 {offsets = [0, 9], sizes = [8, 1], strides = [1, 1]} : vector<8x25xf32> to vector<8x1xf32>
    %148 = vector.broadcast %147 : vector<8x1xf32> to vector<8x256xf32>
    %149 = arith.mulf %146, %148 : vector<8x256xf32>
    %150 = arith.addf %145, %149 : vector<8x256xf32>
    %c0_39 = arith.constant 0 : index
    %c258 = arith.constant 258 : index
    %151 = vector.load %arg11[%c0_39, %c258] : memref<8x768xf32, #tpu.memory_space<vmem>>, vector<8x256xf32>
    %152 = vector.extract_strided_slice %24 {offsets = [0, 14], sizes = [8, 1], strides = [1, 1]} : vector<8x25xf32> to vector<8x1xf32>
    %153 = vector.broadcast %152 : vector<8x1xf32> to vector<8x256xf32>
    %154 = arith.mulf %151, %153 : vector<8x256xf32>
    %155 = arith.addf %150, %154 : vector<8x256xf32>
    %c0_40 = arith.constant 0 : index
    %c274 = arith.constant 274 : index
    %156 = vector.load %arg11[%c0_40, %c274] : memref<8x768xf32, #tpu.memory_space<vmem>>, vector<8x256xf32>
    %157 = vector.extract_strided_slice %24 {offsets = [0, 19], sizes = [8, 1], strides = [1, 1]} : vector<8x25xf32> to vector<8x1xf32>
    %158 = vector.broadcast %157 : vector<8x1xf32> to vector<8x256xf32>
    %159 = arith.mulf %156, %158 : vector<8x256xf32>
    %160 = arith.addf %155, %159 : vector<8x256xf32>
    %c0_41 = arith.constant 0 : index
    %c290 = arith.constant 290 : index
    %161 = vector.load %arg11[%c0_41, %c290] : memref<8x768xf32, #tpu.memory_space<vmem>>, vector<8x256xf32>
    %162 = vector.extract_strided_slice %24 {offsets = [0, 24], sizes = [8, 1], strides = [1, 1]} : vector<8x25xf32> to vector<8x1xf32>
    %163 = vector.broadcast %162 : vector<8x1xf32> to vector<8x256xf32>
    %164 = arith.mulf %161, %163 : vector<8x256xf32>
    %165 = arith.addf %160, %164 : vector<8x256xf32>
    %c14_i32 = arith.constant 14 : i32
    %166 = vector.broadcast %c14_i32 : i32 to vector<1x256xi32>
    %167 = arith.cmpi slt, %16, %166 : vector<1x256xi32>
    %cst_42 = arith.constant 0.000000e+00 : f32
    %168 = vector.shape_cast %167 : vector<1x256xi1> to vector<1x256xi1>
    %169 = vector.broadcast %168 : vector<1x256xi1> to vector<8x256xi1>
    %170 = vector.broadcast %cst_42 : f32 to vector<8x256xf32>
    %171 = arith.select %169, %165, %170 : vector<8x256xi1>, vector<8x256xf32>
    %172 = arith.addf %141, %171 : vector<8x256xf32>
    %c0_43 = arith.constant 0 : index
    %c0_44 = arith.constant 0 : index
    %173 = vector.load %arg3[%c0_43, %c0_44] : memref<8x1xf32, #tpu.memory_space<vmem>>, vector<8x1xf32>
    %174 = vector.broadcast %173 : vector<8x1xf32> to vector<8x256xf32>
    %175 = arith.addf %172, %174 : vector<8x256xf32>
    %c0_45 = arith.constant 0 : index
    %c256_46 = arith.constant 256 : index
    %176 = vector.load %arg11[%c0_45, %c256_46] : memref<8x768xf32, #tpu.memory_space<vmem>>, vector<8x256xf32>
    tpu.vector_store %arg11[%c0_45, %c256_46], %175 {strides = array<i32>} : memref<8x768xf32, #tpu.memory_space<vmem>>, vector<8x256xf32>,
    %c0_47 = arith.constant 0 : index
    %c0_48 = arith.constant 0 : index
    %177 = vector.load %arg4[%c0_47, %c0_48] : memref<8x7xf32, #tpu.memory_space<vmem>>, vector<8x7xf32>
    %c0_49 = arith.constant 0 : index
    %c112 = arith.constant 112 : index
    %178 = vector.load %arg11[%c0_49, %c112] : memref<8x768xf32, #tpu.memory_space<vmem>>, vector<8x256xf32>
    %179 = vector.extract_strided_slice %177 {offsets = [0, 0], sizes = [8, 1], strides = [1, 1]} : vector<8x7xf32> to vector<8x1xf32>
    %180 = vector.broadcast %179 : vector<8x1xf32> to vector<8x256xf32>
    %181 = arith.mulf %178, %180 : vector<8x256xf32>
    %c0_50 = arith.constant 0 : index
    %c160 = arith.constant 160 : index
    %182 = vector.load %arg11[%c0_50, %c160] : memref<8x768xf32, #tpu.memory_space<vmem>>, vector<8x256xf32>
    %183 = vector.extract_strided_slice %177 {offsets = [0, 1], sizes = [8, 1], strides = [1, 1]} : vector<8x7xf32> to vector<8x1xf32>
    %184 = vector.broadcast %183 : vector<8x1xf32> to vector<8x256xf32>
    %185 = arith.mulf %182, %184 : vector<8x256xf32>
    %186 = arith.addf %181, %185 : vector<8x256xf32>
    %c0_51 = arith.constant 0 : index
    %c208 = arith.constant 208 : index
    %187 = vector.load %arg11[%c0_51, %c208] : memref<8x768xf32, #tpu.memory_space<vmem>>, vector<8x256xf32>
    %188 = vector.extract_strided_slice %177 {offsets = [0, 2], sizes = [8, 1], strides = [1, 1]} : vector<8x7xf32> to vector<8x1xf32>
    %189 = vector.broadcast %188 : vector<8x1xf32> to vector<8x256xf32>
    %190 = arith.mulf %187, %189 : vector<8x256xf32>
    %191 = arith.addf %186, %190 : vector<8x256xf32>
    %c0_52 = arith.constant 0 : index
    %c256_53 = arith.constant 256 : index
    %192 = vector.load %arg11[%c0_52, %c256_53] : memref<8x768xf32, #tpu.memory_space<vmem>>, vector<8x256xf32>
    %193 = vector.extract_strided_slice %177 {offsets = [0, 3], sizes = [8, 1], strides = [1, 1]} : vector<8x7xf32> to vector<8x1xf32>
    %194 = vector.broadcast %193 : vector<8x1xf32> to vector<8x256xf32>
    %195 = arith.mulf %192, %194 : vector<8x256xf32>
    %196 = arith.addf %191, %195 : vector<8x256xf32>
    %c0_54 = arith.constant 0 : index
    %c304 = arith.constant 304 : index
    %197 = vector.load %arg11[%c0_54, %c304] : memref<8x768xf32, #tpu.memory_space<vmem>>, vector<8x256xf32>
    %198 = vector.extract_strided_slice %177 {offsets = [0, 4], sizes = [8, 1], strides = [1, 1]} : vector<8x7xf32> to vector<8x1xf32>
    %199 = vector.broadcast %198 : vector<8x1xf32> to vector<8x256xf32>
    %200 = arith.mulf %197, %199 : vector<8x256xf32>
    %201 = arith.addf %196, %200 : vector<8x256xf32>
    %c0_55 = arith.constant 0 : index
    %c352 = arith.constant 352 : index
    %202 = vector.load %arg11[%c0_55, %c352] : memref<8x768xf32, #tpu.memory_space<vmem>>, vector<8x256xf32>
    %203 = vector.extract_strided_slice %177 {offsets = [0, 5], sizes = [8, 1], strides = [1, 1]} : vector<8x7xf32> to vector<8x1xf32>
    %204 = vector.broadcast %203 : vector<8x1xf32> to vector<8x256xf32>
    %205 = arith.mulf %202, %204 : vector<8x256xf32>
    %206 = arith.addf %201, %205 : vector<8x256xf32>
    %c0_56 = arith.constant 0 : index
    %c400 = arith.constant 400 : index
    %207 = vector.load %arg11[%c0_56, %c400] : memref<8x768xf32, #tpu.memory_space<vmem>>, vector<8x256xf32>
    %208 = vector.extract_strided_slice %177 {offsets = [0, 6], sizes = [8, 1], strides = [1, 1]} : vector<8x7xf32> to vector<8x1xf32>
    %209 = vector.broadcast %208 : vector<8x1xf32> to vector<8x256xf32>
    %210 = arith.mulf %207, %209 : vector<8x256xf32>
    %211 = arith.addf %206, %210 : vector<8x256xf32>
    %c0_57 = arith.constant 0 : index
    %c0_58 = arith.constant 0 : index
    %212 = vector.load %arg5[%c0_57, %c0_58] : memref<8x1xf32, #tpu.memory_space<vmem>>, vector<8x1xf32>
    %213 = vector.broadcast %212 : vector<8x1xf32> to vector<8x256xf32>
    %214 = arith.addf %211, %213 : vector<8x256xf32>
    %cst_59 = arith.constant dense<0.000000e+00> : vector<256xf32>
    %215 = vector.multi_reduction <add>, %175, %cst_59 [0] : vector<8x256xf32> to vector<256xf32>
    %216 = vector.shape_cast %215 : vector<256xf32> to vector<1x256xf32>
    %cst_60 = arith.constant dense<0.000000e+00> : vector<256xf32>
    %217 = vector.multi_reduction <add>, %214, %cst_60 [0] : vector<8x256xf32> to vector<256xf32>
    %218 = vector.shape_cast %217 : vector<256xf32> to vector<1x256xf32>
    %219 = arith.addf %216, %218 : vector<1x256xf32>
    %cst_61 = arith.constant 6.250000e-02 : f32
    %220 = vector.broadcast %cst_61 : f32 to vector<1x256xf32>
    %221 = arith.mulf %219, %220 : vector<1x256xf32>
    %cst_62 = arith.constant dense<0xFF800000> : vector<256xf32>
    %222 = vector.multi_reduction <maximumf>, %175, %cst_62 [0] : vector<8x256xf32> to vector<256xf32>
    %223 = vector.shape_cast %222 : vector<256xf32> to vector<1x256xf32>
    %cst_63 = arith.constant dense<0xFF800000> : vector<256xf32>
    %224 = vector.multi_reduction <maximumf>, %214, %cst_63 [0] : vector<8x256xf32> to vector<256xf32>
    %225 = vector.shape_cast %224 : vector<256xf32> to vector<1x256xf32>
    %226 = arith.maximumf %223, %225 : vector<1x256xf32>
    %227 = tpu.concatenate %221, %226 in 0 : vector<1x256xf32>, vector<1x256xf32> -> vector<2x256xf32>
    %c0_64 = arith.constant 0 : index
    %c256_65 = arith.constant 256 : index
    %228 = vector.load %arg11[%c0_64, %c256_65] : memref<8x768xf32, #tpu.memory_space<vmem>>, vector<2x256xf32>
    tpu.vector_store %arg11[%c0_64, %c256_65], %227 {strides = array<i32>} : memref<8x768xf32, #tpu.memory_space<vmem>>, vector<2x256xf32>,
    %c0_66 = arith.constant 0 : index
    %c0_67 = arith.constant 0 : index
    %229 = vector.load %arg6[%c0_66, %c0_67] : memref<2x11xf32, #tpu.memory_space<vmem>>, vector<2x11xf32>
    %c0_68 = arith.constant 0 : index
    %c251 = arith.constant 251 : index
    %230 = vector.load %arg11[%c0_68, %c251] : memref<8x768xf32, #tpu.memory_space<vmem>>, vector<2x256xf32>
    %231 = vector.extract_strided_slice %229 {offsets = [0, 0], sizes = [2, 1], strides = [1, 1]} : vector<2x11xf32> to vector<2x1xf32>
    %232 = vector.broadcast %231 : vector<2x1xf32> to vector<2x256xf32>
    %233 = arith.mulf %230, %232 : vector<2x256xf32>
    %c5_i32 = arith.constant 5 : i32
    %234 = vector.broadcast %c5_i32 : i32 to vector<1x256xi32>
    %235 = arith.cmpi sge, %16, %234 : vector<1x256xi32>
    %cst_69 = arith.constant 0.000000e+00 : f32
    %236 = vector.shape_cast %235 : vector<1x256xi1> to vector<1x256xi1>
    %237 = vector.broadcast %236 : vector<1x256xi1> to vector<2x256xi1>
    %238 = vector.broadcast %cst_69 : f32 to vector<2x256xf32>
    %239 = arith.select %237, %233, %238 : vector<2x256xi1>, vector<2x256xf32>
    %c0_70 = arith.constant 0 : index
    %c252 = arith.constant 252 : index
    %240 = vector.load %arg11[%c0_70, %c252] : memref<8x768xf32, #tpu.memory_space<vmem>>, vector<2x256xf32>
    %241 = vector.extract_strided_slice %229 {offsets = [0, 1], sizes = [2, 1], strides = [1, 1]} : vector<2x11xf32> to vector<2x1xf32>
    %242 = vector.broadcast %241 : vector<2x1xf32> to vector<2x256xf32>
    %243 = arith.mulf %240, %242 : vector<2x256xf32>
    %c4_i32 = arith.constant 4 : i32
    %244 = vector.broadcast %c4_i32 : i32 to vector<1x256xi32>
    %245 = arith.cmpi sge, %16, %244 : vector<1x256xi32>
    %cst_71 = arith.constant 0.000000e+00 : f32
    %246 = vector.shape_cast %245 : vector<1x256xi1> to vector<1x256xi1>
    %247 = vector.broadcast %246 : vector<1x256xi1> to vector<2x256xi1>
    %248 = vector.broadcast %cst_71 : f32 to vector<2x256xf32>
    %249 = arith.select %247, %243, %248 : vector<2x256xi1>, vector<2x256xf32>
    %250 = arith.addf %239, %249 : vector<2x256xf32>
    %c0_72 = arith.constant 0 : index
    %c253 = arith.constant 253 : index
    %251 = vector.load %arg11[%c0_72, %c253] : memref<8x768xf32, #tpu.memory_space<vmem>>, vector<2x256xf32>
    %252 = vector.extract_strided_slice %229 {offsets = [0, 2], sizes = [2, 1], strides = [1, 1]} : vector<2x11xf32> to vector<2x1xf32>
    %253 = vector.broadcast %252 : vector<2x1xf32> to vector<2x256xf32>
    %254 = arith.mulf %251, %253 : vector<2x256xf32>
    %c3_i32 = arith.constant 3 : i32
    %255 = vector.broadcast %c3_i32 : i32 to vector<1x256xi32>
    %256 = arith.cmpi sge, %16, %255 : vector<1x256xi32>
    %cst_73 = arith.constant 0.000000e+00 : f32
    %257 = vector.shape_cast %256 : vector<1x256xi1> to vector<1x256xi1>
    %258 = vector.broadcast %257 : vector<1x256xi1> to vector<2x256xi1>
    %259 = vector.broadcast %cst_73 : f32 to vector<2x256xf32>
    %260 = arith.select %258, %254, %259 : vector<2x256xi1>, vector<2x256xf32>
    %261 = arith.addf %250, %260 : vector<2x256xf32>
    %c0_74 = arith.constant 0 : index
    %c254_75 = arith.constant 254 : index
    %262 = vector.load %arg11[%c0_74, %c254_75] : memref<8x768xf32, #tpu.memory_space<vmem>>, vector<2x256xf32>
    %263 = vector.extract_strided_slice %229 {offsets = [0, 3], sizes = [2, 1], strides = [1, 1]} : vector<2x11xf32> to vector<2x1xf32>
    %264 = vector.broadcast %263 : vector<2x1xf32> to vector<2x256xf32>
    %265 = arith.mulf %262, %264 : vector<2x256xf32>
    %c2_i32_76 = arith.constant 2 : i32
    %266 = vector.broadcast %c2_i32_76 : i32 to vector<1x256xi32>
    %267 = arith.cmpi sge, %16, %266 : vector<1x256xi32>
    %cst_77 = arith.constant 0.000000e+00 : f32
    %268 = vector.shape_cast %267 : vector<1x256xi1> to vector<1x256xi1>
    %269 = vector.broadcast %268 : vector<1x256xi1> to vector<2x256xi1>
    %270 = vector.broadcast %cst_77 : f32 to vector<2x256xf32>
    %271 = arith.select %269, %265, %270 : vector<2x256xi1>, vector<2x256xf32>
    %272 = arith.addf %261, %271 : vector<2x256xf32>
    %c0_78 = arith.constant 0 : index
    %c255_79 = arith.constant 255 : index
    %273 = vector.load %arg11[%c0_78, %c255_79] : memref<8x768xf32, #tpu.memory_space<vmem>>, vector<2x256xf32>
    %274 = vector.extract_strided_slice %229 {offsets = [0, 4], sizes = [2, 1], strides = [1, 1]} : vector<2x11xf32> to vector<2x1xf32>
    %275 = vector.broadcast %274 : vector<2x1xf32> to vector<2x256xf32>
    %276 = arith.mulf %273, %275 : vector<2x256xf32>
    %c1_i32_80 = arith.constant 1 : i32
    %277 = vector.broadcast %c1_i32_80 : i32 to vector<1x256xi32>
    %278 = arith.cmpi sge, %16, %277 : vector<1x256xi32>
    %cst_81 = arith.constant 0.000000e+00 : f32
    %279 = vector.shape_cast %278 : vector<1x256xi1> to vector<1x256xi1>
    %280 = vector.broadcast %279 : vector<1x256xi1> to vector<2x256xi1>
    %281 = vector.broadcast %cst_81 : f32 to vector<2x256xf32>
    %282 = arith.select %280, %276, %281 : vector<2x256xi1>, vector<2x256xf32>
    %283 = arith.addf %272, %282 : vector<2x256xf32>
    %c0_82 = arith.constant 0 : index
    %c256_83 = arith.constant 256 : index
    %284 = vector.load %arg11[%c0_82, %c256_83] : memref<8x768xf32, #tpu.memory_space<vmem>>, vector<2x256xf32>
    %285 = vector.extract_strided_slice %229 {offsets = [0, 5], sizes = [2, 1], strides = [1, 1]} : vector<2x11xf32> to vector<2x1xf32>
    %286 = vector.broadcast %285 : vector<2x1xf32> to vector<2x256xf32>
    %287 = arith.mulf %284, %286 : vector<2x256xf32>
    %288 = arith.addf %283, %287 : vector<2x256xf32>
    %c0_84 = arith.constant 0 : index
    %c257_85 = arith.constant 257 : index
    %289 = vector.load %arg11[%c0_84, %c257_85] : memref<8x768xf32, #tpu.memory_space<vmem>>, vector<2x256xf32>
    %290 = vector.extract_strided_slice %229 {offsets = [0, 6], sizes = [2, 1], strides = [1, 1]} : vector<2x11xf32> to vector<2x1xf32>
    %291 = vector.broadcast %290 : vector<2x1xf32> to vector<2x256xf32>
    %292 = arith.mulf %289, %291 : vector<2x256xf32>
    %c15_i32_86 = arith.constant 15 : i32
    %293 = vector.broadcast %c15_i32_86 : i32 to vector<1x256xi32>
    %294 = arith.cmpi slt, %16, %293 : vector<1x256xi32>
    %cst_87 = arith.constant 0.000000e+00 : f32
    %295 = vector.shape_cast %294 : vector<1x256xi1> to vector<1x256xi1>
    %296 = vector.broadcast %295 : vector<1x256xi1> to vector<2x256xi1>
    %297 = vector.broadcast %cst_87 : f32 to vector<2x256xf32>
    %298 = arith.select %296, %292, %297 : vector<2x256xi1>, vector<2x256xf32>
    %299 = arith.addf %288, %298 : vector<2x256xf32>
    %c0_88 = arith.constant 0 : index
    %c258_89 = arith.constant 258 : index
    %300 = vector.load %arg11[%c0_88, %c258_89] : memref<8x768xf32, #tpu.memory_space<vmem>>, vector<2x256xf32>
    %301 = vector.extract_strided_slice %229 {offsets = [0, 7], sizes = [2, 1], strides = [1, 1]} : vector<2x11xf32> to vector<2x1xf32>
    %302 = vector.broadcast %301 : vector<2x1xf32> to vector<2x256xf32>
    %303 = arith.mulf %300, %302 : vector<2x256xf32>
    %c14_i32_90 = arith.constant 14 : i32
    %304 = vector.broadcast %c14_i32_90 : i32 to vector<1x256xi32>
    %305 = arith.cmpi slt, %16, %304 : vector<1x256xi32>
    %cst_91 = arith.constant 0.000000e+00 : f32
    %306 = vector.shape_cast %305 : vector<1x256xi1> to vector<1x256xi1>
    %307 = vector.broadcast %306 : vector<1x256xi1> to vector<2x256xi1>
    %308 = vector.broadcast %cst_91 : f32 to vector<2x256xf32>
    %309 = arith.select %307, %303, %308 : vector<2x256xi1>, vector<2x256xf32>
    %310 = arith.addf %299, %309 : vector<2x256xf32>
    %c0_92 = arith.constant 0 : index
    %c259 = arith.constant 259 : index
    %311 = vector.load %arg11[%c0_92, %c259] : memref<8x768xf32, #tpu.memory_space<vmem>>, vector<2x256xf32>
    %312 = vector.extract_strided_slice %229 {offsets = [0, 8], sizes = [2, 1], strides = [1, 1]} : vector<2x11xf32> to vector<2x1xf32>
    %313 = vector.broadcast %312 : vector<2x1xf32> to vector<2x256xf32>
    %314 = arith.mulf %311, %313 : vector<2x256xf32>
    %c13_i32 = arith.constant 13 : i32
    %315 = vector.broadcast %c13_i32 : i32 to vector<1x256xi32>
    %316 = arith.cmpi slt, %16, %315 : vector<1x256xi32>
    %cst_93 = arith.constant 0.000000e+00 : f32
    %317 = vector.shape_cast %316 : vector<1x256xi1> to vector<1x256xi1>
    %318 = vector.broadcast %317 : vector<1x256xi1> to vector<2x256xi1>
    %319 = vector.broadcast %cst_93 : f32 to vector<2x256xf32>
    %320 = arith.select %318, %314, %319 : vector<2x256xi1>, vector<2x256xf32>
    %321 = arith.addf %310, %320 : vector<2x256xf32>
    %c0_94 = arith.constant 0 : index
    %c260 = arith.constant 260 : index
    %322 = vector.load %arg11[%c0_94, %c260] : memref<8x768xf32, #tpu.memory_space<vmem>>, vector<2x256xf32>
    %323 = vector.extract_strided_slice %229 {offsets = [0, 9], sizes = [2, 1], strides = [1, 1]} : vector<2x11xf32> to vector<2x1xf32>
    %324 = vector.broadcast %323 : vector<2x1xf32> to vector<2x256xf32>
    %325 = arith.mulf %322, %324 : vector<2x256xf32>
    %c12_i32 = arith.constant 12 : i32
    %326 = vector.broadcast %c12_i32 : i32 to vector<1x256xi32>
    %327 = arith.cmpi slt, %16, %326 : vector<1x256xi32>
    %cst_95 = arith.constant 0.000000e+00 : f32
    %328 = vector.shape_cast %327 : vector<1x256xi1> to vector<1x256xi1>
    %329 = vector.broadcast %328 : vector<1x256xi1> to vector<2x256xi1>
    %330 = vector.broadcast %cst_95 : f32 to vector<2x256xf32>
    %331 = arith.select %329, %325, %330 : vector<2x256xi1>, vector<2x256xf32>
    %332 = arith.addf %321, %331 : vector<2x256xf32>
    %c0_96 = arith.constant 0 : index
    %c261 = arith.constant 261 : index
    %333 = vector.load %arg11[%c0_96, %c261] : memref<8x768xf32, #tpu.memory_space<vmem>>, vector<2x256xf32>
    %334 = vector.extract_strided_slice %229 {offsets = [0, 10], sizes = [2, 1], strides = [1, 1]} : vector<2x11xf32> to vector<2x1xf32>
    %335 = vector.broadcast %334 : vector<2x1xf32> to vector<2x256xf32>
    %336 = arith.mulf %333, %335 : vector<2x256xf32>
    %c11_i32 = arith.constant 11 : i32
    %337 = vector.broadcast %c11_i32 : i32 to vector<1x256xi32>
    %338 = arith.cmpi slt, %16, %337 : vector<1x256xi32>
    %cst_97 = arith.constant 0.000000e+00 : f32
    %339 = vector.shape_cast %338 : vector<1x256xi1> to vector<1x256xi1>
    %340 = vector.broadcast %339 : vector<1x256xi1> to vector<2x256xi1>
    %341 = vector.broadcast %cst_97 : f32 to vector<2x256xf32>
    %342 = arith.select %340, %336, %341 : vector<2x256xi1>, vector<2x256xf32>
    %343 = arith.addf %332, %342 : vector<2x256xf32>
    %c0_98 = arith.constant 0 : index
    %c0_99 = arith.constant 0 : index
    %344 = vector.load %arg7[%c0_98, %c0_99] : memref<2x1xf32, #tpu.memory_space<vmem>>, vector<2x1xf32>
    %345 = vector.broadcast %344 : vector<2x1xf32> to vector<2x256xf32>
    %346 = arith.addf %343, %345 : vector<2x256xf32>
    %c0_100 = arith.constant 0 : index
    %c256_101 = arith.constant 256 : index
    %347 = vector.load %arg11[%c0_100, %c256_101] : memref<8x768xf32, #tpu.memory_space<vmem>>, vector<2x256xf32>
    tpu.vector_store %arg11[%c0_100, %c256_101], %346 {strides = array<i32>} : memref<8x768xf32, #tpu.memory_space<vmem>>, vector<2x256xf32>,
    %c0_102 = arith.constant 0 : index
    %c0_103 = arith.constant 0 : index
    %348 = vector.load %arg8[%c0_102, %c0_103] : memref<2x11xf32, #tpu.memory_space<vmem>>, vector<2x11xf32>
    %c0_104 = arith.constant 0 : index
    %c176 = arith.constant 176 : index
    %349 = vector.load %arg11[%c0_104, %c176] : memref<8x768xf32, #tpu.memory_space<vmem>>, vector<2x256xf32>
    %350 = vector.extract_strided_slice %348 {offsets = [0, 0], sizes = [2, 1], strides = [1, 1]} : vector<2x11xf32> to vector<2x1xf32>
    %351 = vector.broadcast %350 : vector<2x1xf32> to vector<2x256xf32>
    %352 = arith.mulf %349, %351 : vector<2x256xf32>
    %c0_105 = arith.constant 0 : index
    %c192 = arith.constant 192 : index
    %353 = vector.load %arg11[%c0_105, %c192] : memref<8x768xf32, #tpu.memory_space<vmem>>, vector<2x256xf32>
    %354 = vector.extract_strided_slice %348 {offsets = [0, 1], sizes = [2, 1], strides = [1, 1]} : vector<2x11xf32> to vector<2x1xf32>
    %355 = vector.broadcast %354 : vector<2x1xf32> to vector<2x256xf32>
    %356 = arith.mulf %353, %355 : vector<2x256xf32>
    %357 = arith.addf %352, %356 : vector<2x256xf32>
    %c0_106 = arith.constant 0 : index
    %c208_107 = arith.constant 208 : index
    %358 = vector.load %arg11[%c0_106, %c208_107] : memref<8x768xf32, #tpu.memory_space<vmem>>, vector<2x256xf32>
    %359 = vector.extract_strided_slice %348 {offsets = [0, 2], sizes = [2, 1], strides = [1, 1]} : vector<2x11xf32> to vector<2x1xf32>
    %360 = vector.broadcast %359 : vector<2x1xf32> to vector<2x256xf32>
    %361 = arith.mulf %358, %360 : vector<2x256xf32>
    %362 = arith.addf %357, %361 : vector<2x256xf32>
    %c0_108 = arith.constant 0 : index
    %c224_109 = arith.constant 224 : index
    %363 = vector.load %arg11[%c0_108, %c224_109] : memref<8x768xf32, #tpu.memory_space<vmem>>, vector<2x256xf32>
    %364 = vector.extract_strided_slice %348 {offsets = [0, 3], sizes = [2, 1], strides = [1, 1]} : vector<2x11xf32> to vector<2x1xf32>
    %365 = vector.broadcast %364 : vector<2x1xf32> to vector<2x256xf32>
    %366 = arith.mulf %363, %365 : vector<2x256xf32>
    %367 = arith.addf %362, %366 : vector<2x256xf32>
    %c0_110 = arith.constant 0 : index
    %c240_111 = arith.constant 240 : index
    %368 = vector.load %arg11[%c0_110, %c240_111] : memref<8x768xf32, #tpu.memory_space<vmem>>, vector<2x256xf32>
    %369 = vector.extract_strided_slice %348 {offsets = [0, 4], sizes = [2, 1], strides = [1, 1]} : vector<2x11xf32> to vector<2x1xf32>
    %370 = vector.broadcast %369 : vector<2x1xf32> to vector<2x256xf32>
    %371 = arith.mulf %368, %370 : vector<2x256xf32>
    %372 = arith.addf %367, %371 : vector<2x256xf32>
    %c0_112 = arith.constant 0 : index
    %c256_113 = arith.constant 256 : index
    %373 = vector.load %arg11[%c0_112, %c256_113] : memref<8x768xf32, #tpu.memory_space<vmem>>, vector<2x256xf32>
    %374 = vector.extract_strided_slice %348 {offsets = [0, 5], sizes = [2, 1], strides = [1, 1]} : vector<2x11xf32> to vector<2x1xf32>
    %375 = vector.broadcast %374 : vector<2x1xf32> to vector<2x256xf32>
    %376 = arith.mulf %373, %375 : vector<2x256xf32>
    %377 = arith.addf %372, %376 : vector<2x256xf32>
    %c0_114 = arith.constant 0 : index
    %c272_115 = arith.constant 272 : index
    %378 = vector.load %arg11[%c0_114, %c272_115] : memref<8x768xf32, #tpu.memory_space<vmem>>, vector<2x256xf32>
    %379 = vector.extract_strided_slice %348 {offsets = [0, 6], sizes = [2, 1], strides = [1, 1]} : vector<2x11xf32> to vector<2x1xf32>
    %380 = vector.broadcast %379 : vector<2x1xf32> to vector<2x256xf32>
    %381 = arith.mulf %378, %380 : vector<2x256xf32>
    %382 = arith.addf %377, %381 : vector<2x256xf32>
    %c0_116 = arith.constant 0 : index
    %c288_117 = arith.constant 288 : index
    %383 = vector.load %arg11[%c0_116, %c288_117] : memref<8x768xf32, #tpu.memory_space<vmem>>, vector<2x256xf32>
    %384 = vector.extract_strided_slice %348 {offsets = [0, 7], sizes = [2, 1], strides = [1, 1]} : vector<2x11xf32> to vector<2x1xf32>
    %385 = vector.broadcast %384 : vector<2x1xf32> to vector<2x256xf32>
    %386 = arith.mulf %383, %385 : vector<2x256xf32>
    %387 = arith.addf %382, %386 : vector<2x256xf32>
    %c0_118 = arith.constant 0 : index
    %c304_119 = arith.constant 304 : index
    %388 = vector.load %arg11[%c0_118, %c304_119] : memref<8x768xf32, #tpu.memory_space<vmem>>, vector<2x256xf32>
    %389 = vector.extract_strided_slice %348 {offsets = [0, 8], sizes = [2, 1], strides = [1, 1]} : vector<2x11xf32> to vector<2x1xf32>
    %390 = vector.broadcast %389 : vector<2x1xf32> to vector<2x256xf32>
    %391 = arith.mulf %388, %390 : vector<2x256xf32>
    %392 = arith.addf %387, %391 : vector<2x256xf32>
    %c0_120 = arith.constant 0 : index
    %c320 = arith.constant 320 : index
    %393 = vector.load %arg11[%c0_120, %c320] : memref<8x768xf32, #tpu.memory_space<vmem>>, vector<2x256xf32>
    %394 = vector.extract_strided_slice %348 {offsets = [0, 9], sizes = [2, 1], strides = [1, 1]} : vector<2x11xf32> to vector<2x1xf32>
    %395 = vector.broadcast %394 : vector<2x1xf32> to vector<2x256xf32>
    %396 = arith.mulf %393, %395 : vector<2x256xf32>
    %397 = arith.addf %392, %396 : vector<2x256xf32>
    %c0_121 = arith.constant 0 : index
    %c336 = arith.constant 336 : index
    %398 = vector.load %arg11[%c0_121, %c336] : memref<8x768xf32, #tpu.memory_space<vmem>>, vector<2x256xf32>
    %399 = vector.extract_strided_slice %348 {offsets = [0, 10], sizes = [2, 1], strides = [1, 1]} : vector<2x11xf32> to vector<2x1xf32>
    %400 = vector.broadcast %399 : vector<2x1xf32> to vector<2x256xf32>
    %401 = arith.mulf %398, %400 : vector<2x256xf32>
    %402 = arith.addf %397, %401 : vector<2x256xf32>
    %c0_122 = arith.constant 0 : index
    %c0_123 = arith.constant 0 : index
    %403 = vector.load %arg9[%c0_122, %c0_123] : memref<2x1xf32, #tpu.memory_space<vmem>>, vector<2x1xf32>
    %404 = vector.broadcast %403 : vector<2x1xf32> to vector<2x256xf32>
    %405 = arith.addf %402, %404 : vector<2x256xf32>
    %406 = arith.negf %405 : vector<2x256xf32>
    %407 = math.exp %406 : vector<2x256xf32>
    %cst_124 = arith.constant 1.000000e+00 : f32
    %408 = vector.broadcast %cst_124 : f32 to vector<2x256xf32>
    %409 = arith.addf %408, %407 : vector<2x256xf32>
    %410 = arith.divf %408, %409 : vector<2x256xf32>
    %411 = vector.extract_strided_slice %410 {offsets = [0, 0], sizes = [1, 256], strides = [1, 1]} : vector<2x256xf32> to vector<1x256xf32>
    %412 = vector.broadcast %411 : vector<1x256xf32> to vector<8x256xf32>
    %413 = arith.mulf %175, %412 : vector<8x256xf32>
    %414 = vector.extract_strided_slice %410 {offsets = [1, 0], sizes = [1, 256], strides = [1, 1]} : vector<2x256xf32> to vector<1x256xf32>
    %415 = vector.broadcast %414 : vector<1x256xf32> to vector<8x256xf32>
    %416 = arith.mulf %214, %415 : vector<8x256xf32>
    %417 = arith.addf %413, %416 : vector<8x256xf32>
    %418 = arith.addf %417, %22 : vector<8x256xf32>
    %c0_125 = arith.constant 0 : index
    %c0_126 = arith.constant 0 : index
    %c0_127 = arith.constant 0 : index
    %419 = vector.load %arg10[%c0_125, %c0_126, %c0_127] : memref<1x8x256xf32, #tpu.memory_space<vmem>>, vector<1x8x256xf32>
    %420 = vector.shape_cast %419 : vector<1x8x256xf32> to vector<8x256xf32>
    %421 = vector.shape_cast %418 : vector<8x256xf32> to vector<1x8x256xf32>
    tpu.vector_store %arg10[%c0_125, %c0_126, %c0_127], %421 {strides = array<i32>} : memref<1x8x256xf32, #tpu.memory_space<vmem>>, vector<1x8x256xf32>,
    return
  }
  func.func @transform_0(%arg0: i32) -> (i32, i32, i32) {
    %c0_i32 = arith.constant 0 : i32
    %c0_i32_0 = arith.constant 0 : i32
    %c0_i32_1 = arith.constant 0 : i32
    return %arg0, %c0_i32, %c0_i32_0 : i32, i32, i32
  }
  func.func @transform_1(%arg0: i32) -> (i32, i32) {
    %c0_i32 = arith.constant 0 : i32
    %c0_i32_0 = arith.constant 0 : i32
    %c0_i32_1 = arith.constant 0 : i32
    return %c0_i32, %c0_i32_0 : i32, i32
  }
  func.func @transform_2(%arg0: i32) -> (i32, i32) {
    %c0_i32 = arith.constant 0 : i32
    %c0_i32_0 = arith.constant 0 : i32
    %c0_i32_1 = arith.constant 0 : i32
    return %c0_i32, %c0_i32_0 : i32, i32
  }
  func.func @transform_3(%arg0: i32) -> (i32, i32) {
    %c0_i32 = arith.constant 0 : i32
    %c0_i32_0 = arith.constant 0 : i32
    %c0_i32_1 = arith.constant 0 : i32
    return %c0_i32, %c0_i32_0 : i32, i32
  }
  func.func @transform_4(%arg0: i32) -> (i32, i32) {
    %c0_i32 = arith.constant 0 : i32
    %c0_i32_0 = arith.constant 0 : i32
    %c0_i32_1 = arith.constant 0 : i32
    return %c0_i32, %c0_i32_0 : i32, i32
  }
  func.func @transform_5(%arg0: i32) -> (i32, i32) {
    %c0_i32 = arith.constant 0 : i32
    %c0_i32_0 = arith.constant 0 : i32
    %c0_i32_1 = arith.constant 0 : i32
    return %c0_i32, %c0_i32_0 : i32, i32
  }
  func.func @transform_6(%arg0: i32) -> (i32, i32) {
    %c0_i32 = arith.constant 0 : i32
    %c0_i32_0 = arith.constant 0 : i32
    %c0_i32_1 = arith.constant 0 : i32
    return %c0_i32, %c0_i32_0 : i32, i32
  }
  func.func @transform_7(%arg0: i32) -> (i32, i32) {
    %c0_i32 = arith.constant 0 : i32
    %c0_i32_0 = arith.constant 0 : i32
    %c0_i32_1 = arith.constant 0 : i32
    return %c0_i32, %c0_i32_0 : i32, i32
  }
  func.func @transform_8(%arg0: i32) -> (i32, i32) {
    %c0_i32 = arith.constant 0 : i32
    %c0_i32_0 = arith.constant 0 : i32
    %c0_i32_1 = arith.constant 0 : i32
    return %c0_i32, %c0_i32_0 : i32, i32
  }
  func.func @transform_9(%arg0: i32) -> (i32, i32, i32) {
    %c0_i32 = arith.constant 0 : i32
    %c0_i32_0 = arith.constant 0 : i32
    %c0_i32_1 = arith.constant 0 : i32
    return %arg0, %c0_i32, %c0_i32_0 : i32, i32, i32
  }
}

</mosaic_0001>

<bundles_post_ra>
// kernel: lck_forward.1
= control target key start
LH: loop header
LB: loop body
LE: loop exit
PB: predicated region body
PF: predicated region fallthrough
CT: control target
= control target key end

     0   :  { %s2238_s30 = smov 0   ;;  %s3042_s0 = inlined_call_operand.vmem [shape: f32[2,8,256], index: 0, kind: input, shape index: {}]   ;;  %s3043_s1 = inlined_call_operand.vmem [shape: f32[8,25], index: 1, kind: input, shape index: {}]   ;;  %s3044_s2 = inlined_call_operand.vmem [shape: f32[8,1], index: 2, kind: input, shape index: {}]   ;;  %s3045_s3 = inlined_call_operand.vmem [shape: f32[8,7], index: 3, kind: input, shape index: {}]   ;;  %s3046_s4 = inlined_call_operand.vmem [shape: f32[8,1], index: 4, kind: input, shape index: {}]   ;;  %s3047_s5 = inlined_call_operand.vmem [shape: f32[2,11], index: 5, kind: input, shape index: {}]   ;;  %s3048_s6 = inlined_call_operand.vmem [shape: f32[2,1], index: 6, kind: input, shape index: {}]   ;;  %s3049_s7 = inlined_call_operand.vmem [shape: f32[2,11], index: 7, kind: input, shape index: {}]   ;;  %s3050_s8 = inlined_call_operand.vmem [shape: f32[2,1], index: 8, kind: input, shape index: {}]   ;;  %s3051_s9 = inlined_call_operand.vmem [shape: f32[2,8,256], index: 9, kind: output, shape index: {}]  }
   0x1 LB: > { %s1992_s10 = sadd.s32 4294967295, %s2139_s30   ;;  %p1996_p0 = scmp.ge.s32.totalorder %s2139_s30, 1  ;;  %s2139_s30 = sphi %s2238_s30, %s19_s30  }
   0x2   : > { %p287_p1 = scmp.lt.s32.totalorder %s2139_s30, 3 }
   0x4   : > { %p288_p2 = pnand %p1996_p0, %p287_p1 }
   0x5   : > { %v2249_v0 = vld [vmem:[%s3043_s1] sm:$0xff] (!%p288_p2)  ;;  %v2141_v1 = vmov (!%p288_p2), 5   ;;  %v3052_v2 = vmov (!%p288_p2), 10   ;;  %v2143_v3 = vmov (!%p288_p2), 6   ;;  %v2144_v4 = vmov (!%p288_p2), 11   ;;  %p323_p3 = scmp.lt.s32.totalorder (!%p288_p2), %s1992_s10, 1 }
   0x6   : > { %291 = sbr.rel (%p288_p2) target bundleno = 1486 (0x5ce), region = 56  ;;  %2063 = vset.pattern.permute.xlu0 (!%p288_p2), %v2141_v1  ;;  %2065 = vset.pattern.permute.xlu1 (!%p288_p2), %v3052_v2  ;;  %v2145_v5 = vmov (!%p288_p2), 0.0   ;;  %v3056_v6 = vmov (!%p288_p2), 7   ;;  %v2147_v7 = vmov (!%p288_p2), 15   ;;  %v2148_v8 = vmov (!%p288_p2), 16   ;;  %s2167_s17 = smov (!%p288_p2), 112  }
   0x7   : > { %381 = vperm.xlu0 (!%p288_p2), %2063, %v2249_v0   ;;  %406 = vperm.xlu1 (!%p288_p2), %2065, %v2249_v0   ;;  %361 = vst [vmem:[#allocation2 + $0x8] sm:$0xff] (!%p288_p2), %v2145_v5  ;;  %362 = vst [vmem:[#allocation2 + $0x20] sm:$0xff] (!%p288_p2), %v2145_v5  ;;  %v2149_v9 = vmov (!%p288_p2), 12   ;;  %v3054_v10 = vmov (!%p288_p2), 8   ;;  %v2151_v11 = vmov (!%p288_p2), 13   ;;  %v2152_v12 = vmov (!%p288_p2), 20  }
   0x8   : > { %v2153_v13 = vmov (!%p288_p2), 18   ;;  %v2154_v14 = vmov (!%p288_p2), 21   ;;  %v2155_v15 = vmov (!%p288_p2), 23   ;;  %v3058_v16 = vmov (!%p288_p2), 9   ;;  %s2168_s18 = smov (!%p288_p2), 96   ;;  %s2169_s19 = smov (!%p288_p2), 80  }
   0x9   : > { %v3064_v17 = vmov (!%p288_p2), 0   ;;  %v2158_v18 = vmov (!%p288_p2), 17   ;;  %v2159_v19 = vmov (!%p288_p2), 3   ;;  %v2160_v20 = vmov (!%p288_p2), 14   ;;  %s2170_s20 = smov (!%p288_p2), 64   ;;  %s2171_s23 = smov (!%p288_p2), 34  }
   0xa   : > { %v3062_v21 = vmov (!%p288_p2), 1   ;;  %v2162_v22 = vmov (!%p288_p2), 22   ;;  %v2163_v23 = vmov (!%p288_p2), 19   ;;  %v2164_v24 = vmov (!%p288_p2), 24   ;;  %s2172_s24 = smov (!%p288_p2), 33   ;;  %s2173_s25 = smov (!%p288_p2), 32  }
   0xb   : > { %2064 = vset.pattern.permute.xlu0 (!%p288_p2), %v2143_v3  ;;  %2066 = vset.pattern.permute.xlu1 (!%p288_p2), %v2144_v4  ;;  %v3060_v25 = vmov (!%p288_p2), 2   ;;  %v2166_v26 = vmov (!%p288_p2), 4   ;;  %vm3069_vm0 = vcmask (!%p288_p2), 654336   ;;  %vm3068_vm1 = vcmask (!%p288_p2), 523264   ;;  %s2174_s26 = smov (!%p288_p2), 31   ;;  %s2175_s27 = smov (!%p288_p2), 30  }
   0xc   : > { %513 = vperm.xlu0 (!%p288_p2), %2064, %v2249_v0   ;;  %537 = vperm.xlu1 (!%p288_p2), %2066, %v2249_v0   ;;  %vm3071_vm2 = vcmask (!%p288_p2), 916480   ;;  %vm3070_vm3 = vcmask (!%p288_p2), 785408   ;;  %vm498_vm4 = vcmask (!%p288_p2), 277504   ;;  %vm623_vm5 = vcmask (!%p288_p2), 269312   ;;  %s2176_s14 = smov (!%p288_p2), 16   ;;  %s2177_s22 = smov (!%p288_p2), 5  }
   0xd   : > { %s3104_s10 = smov (!%p323_p3, %s1992_s10), 1  ;;  %vm3067_vm10 = vcmask 261120   ;;  %vm864_vm11 = vcmask 252928   ;;  %vm991_vm14 = vcmask 244736   ;;  %s2182_s28 = smov 127  }
   0xe   : > { %s2006_s13 = sshll.u32 %s3104_s10, 4  ;;  %s2183_s29 = smov 126  }
   0xf   : > { %s2301_s16 = scalar_lea.vmem %s3042_s0, %s2006_s13  ;;  %s2184_s15 = smov 125  }
  0x10   : > { %2067 = vset.pattern.permute.xlu1 %v3056_v6  ;;  %2068 = vset.pattern.permute.xlu0 %v2147_v7  ;;  %v2304_v27 = vld [vmem:[%s2301_s16] sm:$0xff]  ;;  %v2308_v31 = vld [vmem:[%s2301_s16 + $0x8] sm:$0xff]  ;;  %s2185_s21 = smov 124  }
  0x11   : > { %640 = vperm.xlu1 %2067, %v2249_v0   ;;  %434 = vperm.xlu0 %2068, %v2249_v0  }
  0x15   : > { %2069 = vset.pattern.permute.xlu1 %v2148_v8  ;;  %2071 = vset.pattern.permute.xlu0 %v2149_v9 }
  0x16   : > { %561 = vperm.xlu1 %2069, %v2249_v0   ;;  %664 = vperm.xlu0 %2071, %v2249_v0  }
  0x1a   : > { %2070 = vset.pattern.permute.xlu1 %v3054_v10  ;;  %2074 = vset.pattern.permute.xlu0 %v2151_v11 }
  0x1b   : > { %754 = vperm.xlu1 %2070, %v2249_v0   ;;  %778 = vperm.xlu0 %2074, %v2249_v0  }
  0x1f   : > { %2072 = vset.pattern.permute.xlu1 %v2152_v12  ;;  %2077 = vset.pattern.permute.xlu0 %v2153_v13 }
  0x20   : > { %459 = vperm.xlu1 %2072, %v2249_v0   ;;  %802 = vperm.xlu0 %2077, %v2249_v0  }
  0x24   : > { %2073 = vset.pattern.permute.xlu1 %v2154_v14  ;;  %2080 = vset.pattern.permute.xlu0 %v2155_v15 }
  0x25   : > { %585 = vperm.xlu1 %2073, %v2249_v0   ;;  %826 = vperm.xlu0 %2080, %v2249_v0  }
  0x29   : > { %2075 = vset.pattern.permute.xlu1 %v3058_v16  ;;  %2083 = vset.pattern.permute.xlu0 %v3064_v17 }
  0x2a   : > { %881 = vperm.xlu1 %2075, %v2249_v0   ;;  %374 = vperm.xlu0 %2083, %v2249_v0  }
  0x2e   : > { %2076 = vset.pattern.permute.xlu1 %v2158_v18  ;;  %2086 = vset.pattern.permute.xlu0 %v2159_v19 }
  0x2f   : > { %683 = vperm.xlu1 %2076, %v2249_v0   ;;  %747 = vperm.xlu0 %2086, %v2249_v0  }
  0x33   : > { %2078 = vset.pattern.permute.xlu1 %v2160_v20  ;;  %2089 = vset.pattern.permute.xlu0 %v3062_v21 }
  0x34   : > { %905 = vperm.xlu1 %2078, %v2249_v0  }
  0x38   : > { %2079 = vset.pattern.permute.xlu1 %v2162_v22 }
  0x39   : > { %707 = vperm.xlu1 %2079, %v2249_v0  }
  0x3d   : > { %2081 = vset.pattern.permute.xlu1 %v2163_v23 }
  0x3e   : > { %929 = vperm.xlu1 %2081, %v2249_v0  }
  0x42   : > { %2082 = vset.pattern.permute.xlu1 %v2164_v24 }
  0x43   : > { %953 = vperm.xlu1 %2082, %v2249_v0  }
  0x47   : > { %2084 = vset.pattern.permute.xlu1 %v3062_v21 }
  0x48   : > { %506 = vperm.xlu1 %2084, %v2249_v0  }
  0x4c   : > { %2085 = vset.pattern.permute.xlu1 %v3060_v25 }
  0x4d   : > { %633 = vperm.xlu1 %2085, %v2249_v0  }
  0x51   : > { %2087 = vset.pattern.permute.xlu1 %v2166_v26 }
  0x52   : > { %874 = vperm.xlu1 %2087, %v2249_v0  }
  0x56   : > { %2088 = vset.pattern.permute.xlu1 %v3064_v17 }
  0x86   : > { %v382_v28 = vpop.permute.xlu0 %381  ;;  %v407_v36 = vpop.permute.xlu1 %406 }
  0x87   : > { %v384_v29 = vmul.f32 0.0, %v382_v28  ;;  %v385_v30 = vmul.f32 %v382_v28, %v2304_v27  ;;  %v386_v33 = vmul.f32 %v382_v28, %v2308_v31  ;;  %v409_v38 = vmul.f32 0.0, %v407_v36 }
  0x88   : > { %v410_v39 = vmul.f32 %v407_v36, %v2304_v27  ;;  %v411_v42 = vmul.f32 %v407_v36, %v2308_v31 }
  0x89   : > { %390 = vrot.lane.b32.xlu1 %v384_v29, %s2167_s17  ;;  %392 = vrot.lane.b32.xlu0 %v385_v30, %s2167_s17 }
  0x8b   : > { %v514_v32 = vpop.permute.xlu0 %513  ;;  %v538_v40 = vpop.permute.xlu1 %537 }
  0x8c   : > { %v516_v34 = vmul.f32 0.0, %v514_v32  ;;  %v517_v35 = vmul.f32 %v514_v32, %v2304_v27  ;;  %v518_v37 = vmul.f32 %v514_v32, %v2308_v31  ;;  %v540_v41 = vmul.f32 0.0, %v538_v40 }
  0x8d   : > { %394 = vrot.lane.b32.xlu1 %v386_v33, %s2167_s17  ;;  %v541_v43 = vmul.f32 %v538_v40, %v2304_v27  ;;  %v542_v45 = vmul.f32 %v538_v40, %v2308_v31 }
  0x8e   : > { %522 = vrot.lane.b32.xlu0 %v516_v34, %s2167_s17 }
  0x90   : > { %v641_v44 = vpop.permute.xlu1 %640  ;;  %v435_v48 = vpop.permute.xlu0 %434 }
  0x91   : > { %524 = vrot.lane.b32.xlu1 %v517_v35, %s2167_s17  ;;  %v643_v46 = vmul.f32 0.0, %v641_v44  ;;  %v644_v47 = vmul.f32 %v641_v44, %v2304_v27  ;;  %v437_v49 = vmul.f32 %v435_v48, %v2304_v27  ;;  %v645_v50 = vmul.f32 %v641_v44, %v2308_v31 }
  0x92   : > { %526 = vrot.lane.b32.xlu0 %v518_v37, %s2167_s17  ;;  %v438_v51 = vmul.f32 %v435_v48, %v2308_v31  ;;  %v439_v53 = vmul.f32 0.0, %v435_v48 }
  0x95   : > { %415 = vrot.lane.b32.xlu1 %v409_v38, %s2168_s18  ;;  %v562_v52 = vpop.permute.xlu1 %561  ;;  %v665_v60 = vpop.permute.xlu0 %664 }
  0x96   : > { %417 = vrot.lane.b32.xlu0 %v410_v39, %s2168_s18  ;;  %v564_v54 = vmul.f32 %v562_v52, %v2304_v27  ;;  %v565_v55 = vmul.f32 %v562_v52, %v2308_v31  ;;  %v566_v58 = vmul.f32 0.0, %v562_v52  ;;  %v667_v62 = vmul.f32 %v665_v60, %v2304_v27 }
  0x97   : > { %v668_v0 = vmul.f32 %v665_v60, %v2308_v31 }
  0x99   : > { %419 = vrot.lane.b32.xlu1 %v411_v42, %s2168_s18 }
  0x9a   : > { %546 = vrot.lane.b32.xlu0 %v540_v41, %s2168_s18  ;;  %v755_v56 = vpop.permute.xlu1 %754  ;;  %v779_v12 = vpop.permute.xlu0 %778 }
  0x9b   : > { %v757_v57 = vmul.f32 0.0, %v755_v56  ;;  %v758_v59 = vmul.f32 %v755_v56, %v2304_v27  ;;  %v759_v61 = vmul.f32 %v755_v56, %v2308_v31  ;;  %v781_v14 = vmul.f32 %v779_v12, %v2304_v27 }
  0x9c   : > { %v782_v15 = vmul.f32 %v779_v12, %v2308_v31  ;;  %v783_v22 = vmul.f32 0.0, %v779_v12 }
  0x9d   : > { %548 = vrot.lane.b32.xlu1 %v541_v43, %s2168_s18 }
  0x9e   : > { %550 = vrot.lane.b32.xlu0 %v542_v45, %s2168_s18 }
  0x9f   : > { %v460_v63 = vpop.permute.xlu1 %459  ;;  %v803_v33 = vpop.permute.xlu0 %802 }
  0xa0   : > { %v462_v4 = vmul.f32 %v460_v63, %v2304_v27  ;;  %v463_v5 = vmul.f32 %v460_v63, %v2308_v31  ;;  %v464_v9 = vmul.f32 0.0, %v460_v63  ;;  %v805_v34 = vmul.f32 %v803_v33, %v2304_v27 }
  0xa1   : > { %649 = vrot.lane.b32.xlu1 %v643_v46, %s2167_s17  ;;  %v806_v37 = vmul.f32 %v803_v33, %v2308_v31  ;;  %v807_v38 = vmul.f32 0.0, %v803_v33 }
  0xa2   : > { %651 = vrot.lane.b32.xlu0 %v644_v47, %s2167_s17 }
  0xa4   : > { %v586_v7 = vpop.permute.xlu1 %585  ;;  %v827_v45 = vpop.permute.xlu0 %826 }
  0xa5   : > { %653 = vrot.lane.b32.xlu1 %v645_v50, %s2167_s17  ;;  %v588_v8 = vmul.f32 %v586_v7, %v2304_v27  ;;  %v589_v11 = vmul.f32 %v586_v7, %v2308_v31  ;;  %v590_v13 = vmul.f32 0.0, %v586_v7  ;;  %v830_v50 = vmul.f32 %v827_v45, %v2308_v31 }
  0xa6   : > { %443 = vrot.lane.b32.xlu0 %v437_v49, %s2169_s19  ;;  %v829_v49 = vmul.f32 %v827_v45, %v2304_v27 }
  0xa9   : > { %445 = vrot.lane.b32.xlu1 %v438_v51, %s2169_s19  ;;  %v882_v18 = vpop.permute.xlu1 %881  ;;  %v831_v51 = vmul.f32 0.0, %v827_v45 }
  0xaa   : > { %447 = vrot.lane.b32.xlu0 %v439_v53, %s2169_s19  ;;  %v884_v20 = vmul.f32 0.0, %v882_v18  ;;  %v885_v23 = vmul.f32 %v882_v18, %v2304_v27  ;;  %v886_v28 = vmul.f32 %v882_v18, %v2308_v31  ;;  %v2401_v53 = vpop.permute.xlu0 %374 }
  0xad   : > { %570 = vrot.lane.b32.xlu1 %v564_v54, %s2169_s19 }
  0xae   : > { %572 = vrot.lane.b32.xlu0 %v565_v55, %s2169_s19  ;;  %v684_v24 = vpop.permute.xlu1 %683 }
  0xaf   : > { %v686_v29 = vmul.f32 %v684_v24, %v2304_v27  ;;  %v687_v32 = vmul.f32 %v684_v24, %v2308_v31  ;;  %v688_v35 = vmul.f32 0.0, %v684_v24 }
  0xb1   : > { %574 = vrot.lane.b32.xlu1 %v566_v58, %s2169_s19  ;;  %v2410_v58 = vpop.permute.xlu0 %747 }
  0xb2   : > { %763 = vrot.lane.b32.xlu0 %v757_v57, %s2167_s17  ;;  %v751_v6 = vmul.f32 %v2410_v58, %v2304_v27 }
  0xb3   : > { %v906_v30 = vpop.permute.xlu1 %905 }
  0xb4   : > { %v908_v40 = vmul.f32 %v906_v30, %v2304_v27  ;;  %v909_v41 = vmul.f32 %v906_v30, %v2308_v31  ;;  %v910_v42 = vmul.f32 0.0, %v906_v30 }
  0xb5   : > { %765 = vrot.lane.b32.xlu1 %v758_v59, %s2167_s17 }
  0xb6   : > { %767 = vrot.lane.b32.xlu0 %v759_v61, %s2167_s17 }
  0xb8   : > { %v708_v36 = vpop.permute.xlu1 %707 }
  0xb9   : > { %671 = vrot.lane.b32.xlu1 %v667_v62, %s2168_s18  ;;  %v710_v44 = vmul.f32 %v708_v36, %v2304_v27  ;;  %v711_v46 = vmul.f32 %v708_v36, %v2308_v31  ;;  %v712_v47 = vmul.f32 0.0, %v708_v36 }
  0xba   : > { %673 = vrot.lane.b32.xlu0 %v668_v0, %s2168_s18  ;;  %v1000_v0 = vld [vmem:[%s3044_s2] sm:$0xff] }
  0xbd   : > { %468 = vrot.lane.b32.xlu1 %v462_v4, %s2170_s20  ;;  %v930_v39 = vpop.permute.xlu1 %929 }
  0xbe   : > { %470 = vrot.lane.b32.xlu0 %v463_v5, %s2170_s20  ;;  %v932_v54 = vmul.f32 %v930_v39, %v2304_v27  ;;  %v933_v55 = vmul.f32 %v930_v39, %v2308_v31  ;;  %v934_v56 = vmul.f32 0.0, %v930_v39 }
  0xc1   : > { %472 = vrot.lane.b32.xlu1 %v464_v9, %s2170_s20 }
  0xc2   : > { %594 = vrot.lane.b32.xlu0 %v588_v8, %s2170_s20  ;;  %v954_v43 = vpop.permute.xlu1 %953 }
  0xc3   : > { %v956_v59 = vmul.f32 %v954_v43, %v2304_v27  ;;  %v957_v60 = vmul.f32 %v954_v43, %v2308_v31  ;;  %v958_v63 = vmul.f32 0.0, %v954_v43 }
  0xc5   : > { %596 = vrot.lane.b32.xlu1 %v589_v11, %s2170_s20 }
  0xc6   : > { %598 = vrot.lane.b32.xlu0 %v590_v13, %s2170_s20 }
  0xc7   : > { %v2392_v48 = vpop.permute.xlu1 %506 }
  0xc9   : > { %787 = vrot.lane.b32.xlu1 %v781_v14, %s2168_s18 }
  0xca   : > { %789 = vrot.lane.b32.xlu0 %v782_v15, %s2168_s18 }
  0xcc   : > { %v2399_v52 = vpop.permute.xlu1 %633 }
  0xcd   : > { %791 = vrot.lane.b32.xlu1 %v783_v22, %s2168_s18 }
  0xce   : > { %890 = vrot.lane.b32.xlu0 %v884_v20, %s2167_s17 }
  0xd1   : > { %892 = vrot.lane.b32.xlu1 %v885_v23, %s2167_s17  ;;  %v2408_v57 = vpop.permute.xlu1 %874 }
  0xd2   : > { %894 = vrot.lane.b32.xlu0 %v886_v28, %s2167_s17 }
  0xd5   : > { %692 = vrot.lane.b32.xlu1 %v686_v29, %s2169_s19 }
  0xd6   : > { %694 = vrot.lane.b32.xlu0 %v687_v32, %s2169_s19 }
  0xd9   : > { %696 = vrot.lane.b32.xlu1 %v688_v35, %s2169_s19 }
  0xda   : > { %811 = vrot.lane.b32.xlu0 %v805_v34, %s2169_s19 }
  0xdd   : > { %813 = vrot.lane.b32.xlu1 %v806_v37, %s2169_s19 }
  0xde   : > { %815 = vrot.lane.b32.xlu0 %v807_v38, %s2169_s19  ;;  %v379_v38 = vmul.f32 %v2401_v53, %v2308_v31 }
  0xe1   : > { %914 = vrot.lane.b32.xlu1 %v908_v40, %s2168_s18 }
  0xe2   : > { %916 = vrot.lane.b32.xlu0 %v909_v41, %s2168_s18 }
  0xe5   : > { %918 = vrot.lane.b32.xlu1 %v910_v42, %s2168_s18 }
  0xe6   : > { %716 = vrot.lane.b32.xlu0 %v710_v44, %s2170_s20  ;;  %v511_v44 = vmul.f32 %v2392_v48, %v2308_v31 }
  0xe9   : > { %718 = vrot.lane.b32.xlu1 %v711_v46, %s2170_s20 }
  0xea   : > { %720 = vrot.lane.b32.xlu0 %v712_v47, %s2170_s20 }
  0xed   : > { %835 = vrot.lane.b32.xlu1 %v829_v49, %s2170_s20 }
  0xee   : > { %837 = vrot.lane.b32.xlu0 %v830_v50, %s2170_s20 }
  0xf1   : > { %839 = vrot.lane.b32.xlu1 %v831_v51, %s2170_s20 }
  0xf2   : > { %938 = vrot.lane.b32.xlu0 %v932_v54, %s2169_s19 }
  0xf5   : > { %940 = vrot.lane.b32.xlu1 %v933_v55, %s2169_s19 }
  0xf6   : > { %942 = vrot.lane.b32.xlu0 %v934_v56, %s2169_s19  ;;  %v378_v56 = vmul.f32 %v2401_v53, %v2304_v27 }
  0xf9   : > { %962 = vrot.lane.b32.xlu1 %v956_v59, %s2170_s20 }
  0xfa   : > { %964 = vrot.lane.b32.xlu0 %v957_v60, %s2170_s20 }
  0xfb   : > { %v2417_v61 = vpop.permute.xlu1 %390  ;;  %v2419_v62 = vpop.permute.xlu0 %392 }
  0xfd   : > { %966 = vrot.lane.b32.xlu1 %v958_v63, %s2170_s20 }
  0xff   : > { %v395_v4 = vpop.permute.xlu1 %394 }
 0x100   : > { %v523_v5 = vpop.permute.xlu0 %522  ;;  %v404_v39 = vadd.f32 %v395_v4, %v379_v38  ;;  %v398_v51 = vsel %vm3071_vm2, %v2419_v62, %v395_v4 }
 0x101   : > { %1003 = vperm.xlu1 %2088, %v1000_v0   ;;  %v403_v0 = vadd.f32 %v398_v51, %v378_v56 }
 0x103   : > { %v2425_v7 = vpop.permute.xlu1 %524 }
 0x104   : > { %v2427_v8 = vpop.permute.xlu0 %526 }
 0x105   : > { %2090 = vset.pattern.permute.xlu1 %v3060_v25  ;;  %v535_v47 = vadd.f32 %v2427_v8, %v511_v44 }
 0x107   : > { %v2430_v9 = vpop.permute.xlu1 %415 }
 0x108   : > { %v2432_v11 = vpop.permute.xlu0 %417 }
 0x10b   : > { %v420_v12 = vpop.permute.xlu1 %419 }
 0x10c   : > { %v547_v13 = vpop.permute.xlu0 %546  ;;  %v429_v43 = vadd.f32 %v420_v12, %v404_v39  ;;  %v423_v60 = vsel %vm3070_vm3, %v2432_v11, %v420_v12 }
 0x10d   : > { %v428_v12 = vadd.f32 %v423_v60, %v403_v0 }
 0x10f   : > { %v2434_v14 = vpop.permute.xlu1 %548 }
 0x110   : > { %v2436_v15 = vpop.permute.xlu0 %550  ;;  %v552_v44 = vsel %vm3070_vm3, %v547_v13, %v2434_v14 }
 0x111   : > { %v559_v59 = vadd.f32 %v2436_v15, %v535_v47 }
 0x113   : > { %v2438_v18 = vpop.permute.xlu1 %649 }
 0x114   : > { %v2440_v20 = vpop.permute.xlu0 %651 }
 0x117   : > { %v2442_v22 = vpop.permute.xlu1 %653 }
 0x118   : > { %v2444_v23 = vpop.permute.xlu0 %443 }
 0x11b   : > { %v446_v24 = vpop.permute.xlu1 %445 }
 0x11c   : > { %v448_v28 = vpop.permute.xlu0 %447  ;;  %v450_v38 = vsel %vm3069_vm0, %v2444_v23, %v446_v24 }
 0x11d   : > { %v451_v41 = vsel %vm3069_vm0, %v446_v24, %v448_v28 }
 0x11e   : > { %v457_v45 = vadd.f32 %v451_v41, %v429_v43  ;;  %v509_v41 = vmul.f32 0.0, %v2392_v48 }
 0x11f   : > { %v2446_v29 = vpop.permute.xlu1 %570 }
 0x120   : > { %v2448_v30 = vpop.permute.xlu0 %572 }
 0x123   : > { %v575_v32 = vpop.permute.xlu1 %574 }
 0x124   : > { %v2450_v33 = vpop.permute.xlu0 %763  ;;  %v577_v54 = vsel %vm3069_vm0, %v2448_v30, %v575_v32  ;;  %v528_v32 = vsel %vm3071_vm2, %v523_v5, %v2425_v7  ;;  %v456_v5 = vadd.f32 %v450_v38, %v428_v12 }
 0x125   : > { %v583_v4 = vadd.f32 %v577_v54, %v559_v59  ;;  %v533_v47 = vadd.f32 %v528_v32, %v509_v41  ;;  %v656_v41 = vsel %vm3071_vm2, %v2440_v20, %v2442_v22 }
 0x127   : > { %v2452_v34 = vpop.permute.xlu1 %765 }
 0x128   : > { %v2454_v35 = vpop.permute.xlu0 %767 }
 0x12b   : > { %v2456_v36 = vpop.permute.xlu1 %671 }
 0x12c   : > { %v2458_v37 = vpop.permute.xlu0 %673 }
 0x12f   : > { %v2462_v40 = vpop.permute.xlu1 %468 }
 0x130   : > { %v471_v42 = vpop.permute.xlu0 %470 }
 0x133   : > { %v473_v46 = vpop.permute.xlu1 %472 }
 0x134   : > { %v476_v49 = vsel %vm3068_vm1, %v471_v42, %v473_v46  ;;  %v2469_v50 = vpop.permute.xlu0 %594 }
 0x135   : > { %v482_v55 = vadd.f32 %v476_v49, %v457_v45  ;;  %v475_v45 = vsel %vm3068_vm1, %v2462_v40, %v471_v42  ;;  %v557_v49 = vadd.f32 %v552_v44, %v533_v47  ;;  %v638_v44 = vmul.f32 %v2399_v52, %v2308_v31 }
 0x136   : > { %v481_v51 = vadd.f32 %v475_v45, %v456_v5  ;;  %v675_v45 = vsel %vm3070_vm3, %v2456_v36, %v2458_v37 }
 0x137   : > { %v2480_v63 = vpop.permute.xlu1 %596  ;;  %496 = vrot.lane.b32.xlu0 %v482_v55, %s2171_s23  ;;  %v581_v55 = vadd.f32 %v2446_v29, %v557_v49  ;;  %v662_v49 = vadd.f32 %v2442_v22, %v638_v44 }
 0x138   : > { %v599_v28 = vpop.permute.xlu0 %598 }
 0x139   : > { %v601_v39 = vsel %vm3068_vm1, %v2480_v63, %v599_v28  ;;  %v605_v13 = vadd.f32 %v2469_v50, %v581_v55 }
 0x13a   : > { %v607_v43 = vadd.f32 %v601_v39, %v583_v4 }
 0x13b   : > { %v2494_v46 = vpop.permute.xlu1 %787 }
 0x13c   : > { %621 = vrot.lane.b32.xlu1 %v607_v43, %s2172_s24  ;;  %v790_v24 = vpop.permute.xlu0 %789  ;;  %v637_v43 = vmul.f32 %v2399_v52, %v2304_v27 }
 0x13d   : > { %v793_v22 = vsel %vm3070_vm3, %v2494_v46, %v790_v24 }
 0x13e   : > { %v661_v47 = vadd.f32 %v656_v41, %v637_v43  ;;  %v681_v41 = vadd.f32 %v2458_v37, %v662_v49 }
 0x13f   : > { %v792_v54 = vpop.permute.xlu1 %791 }
 0x140   : > { %v891_v56 = vpop.permute.xlu0 %890  ;;  %494 = vrot.lane.b32.xlu1 %v481_v51, %s2171_s23  ;;  %v680_v2 = vadd.f32 %v675_v45, %v661_v47  ;;  %v752_v45 = vmul.f32 %v2410_v58, %v2308_v31  ;;  %v794_v49 = vsel %vm3070_vm3, %v790_v24, %v792_v54  ;;  %v422_v24 = vsel %vm3070_vm3, %v2430_v9, %v2432_v11 }
 0x141   : > { %v510_v9 = vmul.f32 %v2392_v48, %v2304_v27  ;;  %v576_v48 = vsel %vm3069_vm0, %v2446_v29, %v2448_v30 }
 0x143   : > { %v2500_v59 = vpop.permute.xlu1 %892 }
 0x144   : > { %v2502_v42 = vpop.permute.xlu0 %894  ;;  %617 = vrot.lane.b32.xlu1 %v605_v13, %s2172_s24  ;;  %v770_v13 = vsel %vm3071_vm2, %v2452_v34, %v2454_v35 }
 0x145   : > { %v775_v16 = vadd.f32 %v770_v13, %v751_v6  ;;  %v776_v6 = vadd.f32 %v2454_v35, %v752_v45 }
 0x147   : > { %v2505_v60 = vpop.permute.xlu1 %692  ;;  %v799_v47 = vadd.f32 %v793_v22, %v775_v16 }
 0x148   : > { %v695_v0 = vpop.permute.xlu0 %694 }
 0x149   : > { %v698_v51 = vsel %vm3069_vm0, %v2505_v60, %v695_v0 }
 0x14a   : > { %v704_v43 = vadd.f32 %v698_v51, %v680_v2  ;;  %v397_v51 = vsel %vm3071_vm2, %v2417_v61, %v2419_v62  ;;  %v896_v61 = vsel %vm3071_vm2, %v891_v56, %v2500_v59  ;;  %v553_v56 = vsel %vm3070_vm3, %v2434_v14, %v2436_v15 }
 0x14b   : > { %v697_v4 = vpop.permute.xlu1 %696 }
 0x14c   : > { %v2507_v28 = vpop.permute.xlu0 %811  ;;  %v699_v10 = vsel %vm3069_vm0, %v695_v0, %v697_v4 }
 0x14d   : > { %v705_v25 = vadd.f32 %v699_v10, %v681_v41 }
 0x14f   : > { %v814_v32 = vpop.permute.xlu1 %813 }
 0x150   : > { %v816_v38 = vpop.permute.xlu0 %815  ;;  %v817_v0 = vsel %vm3069_vm0, %v2507_v28, %v814_v32 }
 0x151   : > { %v823_v13 = vadd.f32 %v817_v0, %v799_v47  ;;  %v636_v47 = vmul.f32 0.0, %v2399_v52 }
 0x153   : > { %v2509_v39 = vpop.permute.xlu1 %914 }
 0x154   : > { %v2514_v12 = vpop.permute.xlu0 %916 }
 0x157   : > { %v2523_v5 = vpop.permute.xlu1 %918 }
 0x158   : > { %v2528_v55 = vpop.permute.xlu0 %716 }
 0x15b   : > { %v719_v44 = vpop.permute.xlu1 %718 }
 0x15c   : > { %v722_v21 = vsel %vm3068_vm1, %v2528_v55, %v719_v44  ;;  %v721_v17 = vpop.permute.xlu0 %720 }
 0x15d   : > { %v728_v4 = vadd.f32 %v722_v21, %v704_v43  ;;  %v723_v37 = vsel %vm3068_vm1, %v719_v44, %v721_v17  ;;  %v818_v21 = vsel %vm3069_vm0, %v814_v32, %v816_v38  ;;  %v377_v17 = vmul.f32 0.0, %v2401_v53 }
 0x15e   : > { %v729_v2 = vadd.f32 %v723_v37, %v705_v25  ;;  %v800_v25 = vadd.f32 %v794_v49, %v776_v6  ;;  %v877_v38 = vmul.f32 0.0, %v2408_v57  ;;  %v529_v53 = vsel %vm3071_vm2, %v2425_v7, %v2427_v8 }
 0x15f   : > { %v2548_v10 = vpop.permute.xlu1 %835  ;;  %735 = vrot.lane.b32.xlu1 %v728_v4, %s2173_s25  ;;  %v402_v41 = vadd.f32 %v397_v51, %v377_v17  ;;  %v534_v0 = vadd.f32 %v529_v53, %v510_v9  ;;  %v655_v8 = vsel %vm3071_vm2, %v2438_v18, %v2440_v20  ;;  %v921_v18 = vsel %vm3070_vm3, %v2514_v12, %v2523_v5 }
 0x160   : > { %737 = vrot.lane.b32.xlu0 %v729_v2, %s2173_s25  ;;  %v838_v16 = vpop.permute.xlu0 %837  ;;  %v824_v62 = vadd.f32 %v818_v21, %v800_v25  ;;  %v901_v45 = vadd.f32 %v896_v61, %v877_v38  ;;  %v600_v2 = vsel %vm3068_vm1, %v2469_v50, %v2480_v63  ;;  %v660_v29 = vadd.f32 %v655_v8, %v636_v47 }
 0x161   : > { %v841_v35 = vsel %vm3068_vm1, %v2548_v10, %v838_v16  ;;  %v427_v11 = vadd.f32 %v422_v24, %v402_v41  ;;  %v558_v14 = vadd.f32 %v553_v56, %v534_v0  ;;  %v750_v50 = vmul.f32 0.0, %v2410_v58 }
 0x162   : > { %v847_v54 = vadd.f32 %v841_v35, %v823_v13  ;;  %v925_v37 = vadd.f32 %v2509_v39, %v901_v45  ;;  %v679_v63 = vadd.f32 %v2456_v36, %v660_v29  ;;  %v333_v38 = vlaneseq }
 0x163   : > { %v840_v32 = vpop.permute.xlu1 %839  ;;  %v455_v4 = vadd.f32 %v2444_v23, %v427_v11  ;;  %v879_v23 = vmul.f32 %v2408_v57, %v2308_v31  ;;  %v582_v30 = vadd.f32 %v576_v48, %v558_v14  ;;  %v769_v31 = vsel %vm3071_vm2, %v2450_v33, %v2452_v34 }
 0x164   : > { %v842_v22 = vsel %vm3068_vm1, %v838_v16, %v840_v32  ;;  %v939_v43 = vpop.permute.xlu0 %938  ;;  %860 = vrot.lane.b32.xlu1 %v847_v54, %s2174_s26  ;;  %v774_v21 = vadd.f32 %v769_v31, %v750_v50  ;;  %v703_v16 = vadd.f32 %v2505_v60, %v679_v63  ;;  %v897_v33 = vsel %vm3071_vm2, %v2500_v59, %v2502_v42 }
 0x165   : > { %v848_v44 = vadd.f32 %v842_v22, %v824_v62  ;;  %v480_v15 = vadd.f32 %v2462_v40, %v455_v4  ;;  %v949_v20 = vadd.f32 %v939_v43, %v925_v37  ;;  %v903_v52 = vadd.f32 %v2502_v42, %v879_v23 }
 0x166   : > { %v606_v13 = vadd.f32 %v600_v2, %v582_v30  ;;  %v878_v34 = vmul.f32 %v2408_v57, %v2304_v27  ;;  %v798_v36 = vadd.f32 %v2494_v46, %v774_v21  ;;  %v727_v24 = vadd.f32 %v2528_v55, %v703_v16  ;;  %v1010_v27 = vld [vmem:[%s3045_s3] sm:$0xff] }
 0x167   : > { %v941_v7 = vpop.permute.xlu1 %940  ;;  %862 = vrot.lane.b32.xlu0 %v848_v44, %s2174_s26  ;;  %v927_v5 = vadd.f32 %v921_v18, %v903_v52  ;;  %v920_v60 = vsel %vm3070_vm3, %v2509_v39, %v2514_v12  ;;  %v3074_v12 = vmov 1   ;;  %v334_v22 = vand.u32 127, %v333_v38 }
 0x168   : > { %v943_v49 = vpop.permute.xlu0 %942  ;;  %v902_v41 = vadd.f32 %v897_v33, %v878_v34  ;;  %v822_v61 = vadd.f32 %v2507_v28, %v798_v36  ;;  %v944_v59 = vsel %vm3069_vm0, %v939_v43, %v941_v7  ;;  %v3073_v28 = vmov 0  }
 0x169   : > { %v945_v40 = vsel %vm3069_vm0, %v941_v7, %v943_v49  ;;  %v335_v9 = vadd.s32 128, %v334_v22  ;;  %v2633_v4 = vand.u32 15, %v334_v22 }
 0x16a   : > { %v951_v17 = vadd.f32 %v945_v40, %v927_v5  ;;  %v926_v57 = vadd.f32 %v920_v60, %v902_v41  ;;  %v846_v46 = vadd.f32 %v2548_v10, %v822_v61 }
 0x16b   : > { %v963_v6 = vpop.permute.xlu1 %962  ;;  %492 = vrot.lane.b32.xlu0 %v480_v15, %s2171_s23  ;;  %v2631_v56 = vand.u32 15, %v335_v9  ;;  %vm608_vm8 = vcmp.ge.s32.totalorder %v2633_v4, 1  ;;  %vm483_vm9 = vcmp.ge.s32.totalorder %v2633_v4, 2  ;;  %vm849_vm12 = vcmp.lt.s32.totalorder %v2633_v4, 15  ;;  %s2178_s23 = smov 4  }
 0x16c   : > { %v973_v51 = vadd.f32 %v963_v6, %v949_v20  ;;  %v965_v25 = vpop.permute.xlu0 %964  ;;  %v950_v55 = vadd.f32 %v944_v59, %v926_v57  ;;  %vm976_vm15 = vcmp.lt.s32.totalorder %v2633_v4, 14 }
 0x16d   : > { %v968_v42 = vsel %vm3068_vm1, %v963_v6, %v965_v25  ;;  %vm609_vm6 = vcmp.ge.s32.totalorder %v2631_v56, 1  ;;  %vm484_vm7 = vcmp.ge.s32.totalorder %v2631_v56, 2  ;;  %vm850_vm13 = vcmp.lt.s32.totalorder %v2631_v56, 15 }
 0x16e   : > { %985 = vrot.lane.b32.xlu1 %v973_v51, %s2175_s27  ;;  %v974_v39 = vadd.f32 %v968_v42, %v950_v55 }
 0x16f   : > { %v967_v35 = vpop.permute.xlu1 %966  ;;  %619 = vrot.lane.b32.xlu0 %v606_v13, %s2172_s24  ;;  %s2179_s24 = smov 3  }
 0x170   : > { %v969_v58 = vsel %vm3068_vm1, %v965_v25, %v967_v35 }
 0x171   : > { %v975_v54 = vadd.f32 %v969_v58, %v951_v17 }
 0x173   : > { %733 = vrot.lane.b32.xlu0 %v727_v24, %s2173_s25  ;;  %989 = vrot.lane.b32.xlu1 %v975_v54, %s2175_s27 }
 0x177   : > { %858 = vrot.lane.b32.xlu0 %v846_v46, %s2174_s26  ;;  %1050 = vperm.xlu1 %2090, %v1010_v27   ;;  %v1171_v46 = vld [vmem:[%s3046_s4] sm:$0xff]  ;;  %s2180_s26 = smov 2  }
 0x17b   : > { %987 = vrot.lane.b32.xlu0 %v974_v39, %s2175_s27  ;;  %2091 = vset.pattern.permute.xlu1 %v2159_v19  ;;  %s2181_s27 = smov 1  }
 0x17c   : > { %1074 = vperm.xlu1 %2091, %v1010_v27  }
 0x17f   : > { %1026 = vperm.xlu0 %2089, %v1010_v27  }
 0x180   : > { %2093 = vset.pattern.permute.xlu1 %v2141_v1  ;;  %v1004_v10 = vpop.permute.xlu1 %1003 }
 0x181   : > { %1120 = vperm.xlu1 %2093, %v1010_v27  }
 0x183   : > { %2092 = vset.pattern.permute.xlu0 %v2166_v26 }
 0x184   : > { %1096 = vperm.xlu0 %2092, %v1010_v27  }
 0x185   : > { %2094 = vset.pattern.permute.xlu1 %v2143_v3 }
 0x186   : > { %1148 = vperm.xlu1 %2094, %v1010_v27  }
 0x188   : > { %2095 = vset.pattern.permute.xlu0 %v3073_v28 }
 0x189   : > { %1016 = vperm.xlu0 %2095, %v1010_v27  }
 0x18a   : > { %2096 = vset.pattern.permute.xlu1 %v3074_v12 }
 0x1a9   : > { %v497_v32 = vpop.permute.xlu0 %496 }
 0x1ae   : > { %v622_v62 = vpop.permute.xlu1 %621 }
 0x1b2   : > { %v495_v53 = vpop.permute.xlu1 %494 }
 0x1b3   : > { %v500_v8 = vsel %vm498_vm4, %v495_v53, %v497_v32 }
 0x1b4   : > { %v504_v23 = vsel %vm484_vm7, %v500_v8, 0.0 }
 0x1b6   : > { %v618_v11 = vpop.permute.xlu1 %617 }
 0x1d1   : > { %v736_v45 = vpop.permute.xlu1 %735 }
 0x1d2   : > { %v738_v43 = vpop.permute.xlu0 %737 }
 0x1d3   : > { %v741_v52 = vsel %vm3067_vm10, %v736_v45, %v738_v43 }
 0x1d6   : > { %v861_v47 = vpop.permute.xlu1 %860 }
 0x1d9   : > { %v863_v44 = vpop.permute.xlu0 %862 }
 0x1da   : > { %v866_v40 = vsel %vm864_vm11, %v861_v47, %v863_v44 }
 0x1db   : > { %v870_v13 = vsel %vm850_vm13, %v866_v40, 0.0 }
 0x1dd   : > { %v493_v0 = vpop.permute.xlu0 %492 }
 0x1de   : > { %v499_v15 = vsel %vm498_vm4, %v493_v0, %v495_v53  ;;  %vm3072_vm4 = vcmp.lt.s32.totalorder %v2631_v56, 14 }
 0x1df   : > { %v503_v20 = vsel %vm483_vm9, %v499_v15, 0.0 }
 0x1e0   : > { %v986_v29 = vpop.permute.xlu1 %985 }
 0x1e1   : > { %v620_v7 = vpop.permute.xlu0 %619 }
 0x1e2   : > { %v624_v48 = vsel %vm623_vm5, %v618_v11, %v620_v7  ;;  %v625_v37 = vsel %vm623_vm5, %v620_v7, %v622_v62  ;;  %vm3066_vm5 = vcmask 130048  }
 0x1e3   : > { %v629_v14 = vsel %vm609_vm6, %v625_v37, 0.0  ;;  %v628_v49 = vsel %vm608_vm8, %v624_v48, 0.0 }
 0x1e4   : > { %v631_v18 = vadd.f32 %v629_v14, %v504_v23  ;;  %v630_v30 = vadd.f32 %v628_v49, %v503_v20 }
 0x1e5   : > { %v734_v2 = vpop.permute.xlu0 %733  ;;  %v990_v21 = vpop.permute.xlu1 %989 }
 0x1e6   : > { %v740_v6 = vsel %vm3067_vm10, %v734_v2, %v736_v45  ;;  %v745_v51 = vadd.f32 %v741_v52, %v631_v18 }
 0x1e7   : > { %v744_v5 = vadd.f32 %v740_v6, %v630_v30 }
 0x1e8   : > { %v872_v25 = vadd.f32 %v870_v13, %v745_v51 }
 0x1e9   : > { %v859_v31 = vpop.permute.xlu0 %858 }
 0x1ea   : > { %v865_v50 = vsel %vm864_vm11, %v859_v31, %v861_v47  ;;  %vm1192_vm11 = vcmask 1048448  }
 0x1eb   : > { %v869_v63 = vsel %vm849_vm12, %v865_v50, 0.0 }
 0x1ec   : > { %v871_v17 = vadd.f32 %v869_v63, %v744_v5 }
 0x1ed   : > { %v988_v16 = vpop.permute.xlu0 %987 }
 0x1ee   : > { %v992_v35 = vsel %vm991_vm14, %v986_v29, %v988_v16  ;;  %v993_v33 = vsel %vm991_vm14, %v988_v16, %v990_v21  ;;  %vm1283_vm14 = vcmask 1040384  }
 0x1ef   : > { %v996_v58 = vsel %vm976_vm15, %v992_v35, 0.0  ;;  %v997_v34 = vsel %vm3072_vm4, %v993_v33, 0.0  ;;  %vm1361_vm4 = vcmp.ge.s32.totalorder %v2631_v56, 3 }
 0x1f0   : > { %v998_v36 = vadd.f32 %v996_v58, %v871_v17  ;;  %v999_v24 = vadd.f32 %v997_v34, %v872_v25 }
 0x1f2   : > { %v2661_v54 = vadd.f32 %v1004_v10, %v998_v36  ;;  %v2663_v60 = vadd.f32 %v1004_v10, %v999_v24  ;;  %v2130_v10 = vld [vmem:[#allocation2 + $0x8] sm:$0xff] }
 0x1f4   : > { %1008 = vst [vmem:[#allocation2 + $0x10] sm:$0xff] %v2661_v54  ;;  %1009 = vst [vmem:[#allocation2 + $0x18] sm:$0xff] %v2663_v60 }
 0x1f6   : > { %v1051_v41 = vpop.permute.xlu1 %1050 }
 0x1f7   : > { %v1053_v61 = vmul.f32 0.0, %v1051_v41  ;;  %v1055_v32 = vmul.f32 %v1051_v41, %v2663_v60  ;;  %v1054_v7 = vmul.f32 %v1051_v41, %v2661_v54 }
 0x1f9   : > { %1059 = vrot.lane.b32.xlu1 %v1053_v61, %s2173_s25 }
 0x1fb   : > { %v1075_v59 = vpop.permute.xlu1 %1074 }
 0x1fc   : > { %v1077_v43 = vmul.f32 %v1075_v59, %v2661_v54  ;;  %v1078_v8 = vmul.f32 %v1075_v59, %v2663_v60 }
 0x1fe   : > { %v1027_v27 = vpop.permute.xlu0 %1026 }
 0x1ff   : > { %v1029_v57 = vmul.f32 0.0, %v1027_v27  ;;  %v1030_v11 = vmul.f32 %v1027_v27, %v2661_v54  ;;  %v1031_v45 = vmul.f32 %v1027_v27, %v2663_v60 }
 0x200   : > { %v1121_v42 = vpop.permute.xlu1 %1120 }
 0x201   : > { %1035 = vrot.lane.b32.xlu0 %v1029_v57, %s2169_s19  ;;  %v1125_v62 = vmul.f32 %v2130_v10, %v1121_v42  ;;  %v1124_v44 = vmul.f32 %v1121_v42, %v2663_v60  ;;  %v1123_v0 = vmul.f32 %v1121_v42, %v2661_v54 }
 0x203   : > { %v1097_v55 = vpop.permute.xlu0 %1096 }
 0x204   : > { %v1101_v39 = vmul.f32 0.0, %v1097_v55  ;;  %v1100_v9 = vmul.f32 %v1097_v55, %v2663_v60  ;;  %v1099_v48 = vmul.f32 %v1097_v55, %v2661_v54 }
 0x205   : > { %1174 = vperm.xlu0 %2095, %v1171_v46   ;;  %v1149_v53 = vpop.permute.xlu1 %1148 }
 0x206   : > { %1109 = vrot.lane.b32.xlu1 %v1101_v39, %s2170_s20  ;;  %v1152_v22 = vmul.f32 %v2130_v10, %v1149_v53  ;;  %v1151_v37 = vmul.f32 %v1149_v53, %v2663_v60 }
 0x208   : > { %v1017_v15 = vpop.permute.xlu0 %1016 }
 0x209   : > { %1063 = vrot.lane.b32.xlu0 %v1055_v32, %s2173_s25  ;;  %v1020_v52 = vmul.f32 %v2130_v10, %v1017_v15  ;;  %v1021_v31 = vmul.f32 %v1017_v15, %v2661_v54 }
 0x20a   : > { %1133 = vrot.lane.b32.xlu1 %v1125_v62, %s2176_s14 }
 0x20d   : > { %1081 = vrot.lane.b32.xlu0 %v1077_v43, %s2167_s17 }
 0x20e   : > { %1159 = vrot.lane.b32.xlu1 %v1152_v22, %s2168_s18 }
 0x211   : > { %1107 = vrot.lane.b32.xlu0 %v1100_v9, %s2170_s20 }
 0x212   : > { %1037 = vrot.lane.b32.xlu1 %v1030_v11, %s2169_s19 }
 0x215   : > { %1131 = vrot.lane.b32.xlu0 %v1124_v44, %s2176_s14 }
 0x216   : > { %1039 = vrot.lane.b32.xlu1 %v1031_v45, %s2169_s19 }
 0x219   : > { %1129 = vrot.lane.b32.xlu0 %v1123_v0, %s2176_s14 }
 0x21a   : > { %1061 = vrot.lane.b32.xlu1 %v1054_v7, %s2173_s25 }
 0x21d   : > { %1161 = vrot.lane.b32.xlu0 %v1152_v22, %s2168_s18 }
 0x21e   : > { %1083 = vrot.lane.b32.xlu1 %v1078_v8, %s2167_s17 }
 0x222   : > { %1105 = vrot.lane.b32.xlu1 %v1099_v48, %s2170_s20 }
 0x226   : > { %1157 = vrot.lane.b32.xlu1 %v1151_v37, %s2168_s18 }
 0x26b   : > { %v1060_v47 = vpop.permute.xlu1 %1059 }
 0x273   : > { %v1036_v49 = vpop.permute.xlu0 %1035 }
 0x274   : > { %v1046_v5 = vadd.f32 %v1036_v49, %v1020_v52 }
 0x276   : > { %v1070_v33 = vadd.f32 %v1060_v47, %v1046_v5 }
 0x278   : > { %v1110_v14 = vpop.permute.xlu1 %1109 }
 0x27c   : > { %v1134_v23 = vpop.permute.xlu1 %1133 }
 0x280   : > { %v1160_v2 = vpop.permute.xlu1 %1159 }
 0x284   : > { %v1175_v18 = vpop.permute.xlu0 %1174  ;;  %v1038_v20 = vpop.permute.xlu1 %1037 }
 0x285   : > { %v1041_v13 = vsel %vm3069_vm0, %v1036_v49, %v1038_v20 }
 0x286   : > { %v1047_v35 = vadd.f32 %v1041_v13, %v1020_v52 }
 0x288   : > { %v1064_v29 = vpop.permute.xlu0 %1063  ;;  %v1040_v30 = vpop.permute.xlu1 %1039 }
 0x289   : > { %v1042_v6 = vsel %vm3069_vm0, %v1038_v20, %v1040_v30  ;;  %vm1400_vm0 = vcmask 15360  }
 0x28a   : > { %v1048_v63 = vadd.f32 %v1042_v6, %v1021_v31 }
 0x28c   : > { %v1082_v40 = vpop.permute.xlu0 %1081  ;;  %v1062_v51 = vpop.permute.xlu1 %1061 }
 0x28d   : > { %v1066_v50 = vsel %vm3067_vm10, %v1062_v51, %v1064_v29  ;;  %v1065_v25 = vsel %vm3067_vm10, %v1060_v47, %v1062_v51  ;;  %v1089_v61 = vadd.f32 %v1082_v40, %v1070_v33  ;;  %vm1329_vm10 = vcmp.ge.s32.totalorder %v2633_v4, 4 }
 0x28e   : > { %v1072_v21 = vadd.f32 %v1066_v50, %v1048_v63  ;;  %v1071_v34 = vadd.f32 %v1065_v25, %v1047_v35 }
 0x290   : > { %v1108_v16 = vpop.permute.xlu0 %1107  ;;  %v1084_v17 = vpop.permute.xlu1 %1083 }
 0x291   : > { %v1085_v58 = vsel %vm3071_vm2, %v1082_v40, %v1084_v17  ;;  %v1091_v36 = vadd.f32 %v1084_v17, %v1072_v21  ;;  %v1112_v59 = vsel %vm3068_vm1, %v1108_v16, %v1110_v14 }
 0x292   : > { %v1090_v57 = vadd.f32 %v1085_v58, %v1071_v34 }
 0x293   : > { %v1118_v42 = vadd.f32 %v1112_v59, %v1091_v36 }
 0x294   : > { %v1132_v24 = vpop.permute.xlu0 %1131  ;;  %v1106_v41 = vpop.permute.xlu1 %1105 }
 0x295   : > { %v1111_v27 = vsel %vm3068_vm1, %v1106_v41, %v1108_v16  ;;  %v1116_v46 = vadd.f32 %v1106_v41, %v1089_v61  ;;  %v1137_v62 = vsel %vm3066_vm5, %v1132_v24, %v1134_v23  ;;  %vm1375_vm1 = vcmask 23552  }
 0x296   : > { %v1117_v55 = vadd.f32 %v1111_v27, %v1090_v57  ;;  %v1143_v11 = vadd.f32 %v1137_v62, %v1118_v42  ;;  %v2734_v62 = vld [vmem:[%s3047_s5] sm:$0x3] }
 0x298   : > { %v1130_v39 = vpop.permute.xlu0 %1129  ;;  %v1158_v10 = vpop.permute.xlu1 %1157 }
 0x299   : > { %v1136_v32 = vsel %vm3066_vm5, %v1130_v39, %v1132_v24  ;;  %v1141_v53 = vadd.f32 %v1130_v39, %v1116_v46  ;;  %v1163_v43 = vsel %vm3070_vm3, %v1158_v10, %v1160_v2 }
 0x29a   : > { %v1142_v22 = vadd.f32 %v1136_v32, %v1117_v55  ;;  %v3075_v32 = vmov 2  }
 0x29b   : > { %v1168_v9 = vadd.f32 %v1158_v10, %v1141_v53  ;;  %v3076_v53 = vmov 9  }
 0x29c   : > { %v1169_v44 = vadd.f32 %v1163_v43, %v1142_v22  ;;  %v1162_v45 = vpop.permute.xlu0 %1161  ;;  %v3077_v22 = vmov 7   ;;  %v3078_v43 = vmov 8  }
 0x29d   : > { %v2709_v0 = vadd.f32 %v1175_v18, %v1168_v9  ;;  %v1164_v7 = vsel %vm3070_vm3, %v1160_v2, %v1162_v45  ;;  %v3079_v9 = vmov 10   ;;  %vm1360_vm3 = vcmp.ge.s32.totalorder %v2633_v4, 3 }
 0x29e   : > { %v2712_v8 = vadd.f32 %v1175_v18, %v1169_v44  ;;  %v1170_v48 = vadd.f32 %v1164_v7, %v1143_v11  ;;  %v1180_v11 = vrot.slane %v2661_v54, 4  ;;  %v1186_v7 = vrot.slane %v2663_v60, 4 }
 0x29f   : > { %v1193_v37 = vsel %vm1192_vm11, %v2709_v0, 0.0  ;;  %v1242_v47 = vsel %vm1192_vm11, %v2709_v0, -inf  ;;  %vm1315_vm11 = vcmask 39936  }
 0x2a0   : > { %v1194_v14 = vrot.slane %v1193_v37, 4  ;;  %v1243_v15 = vrot.slane %v1242_v47, 4  ;;  %v2716_v23 = vadd.f32 %v1175_v18, %v1170_v48  ;;  %v1200_v49 = vrot.slane %v2712_v8, 4 }
 0x2a1   : > { %v1231_v44 = vmax.f32 %v2661_v54, %v1180_v11  ;;  %v1181_v45 = vadd.f32 %v1180_v11, %v2661_v54 }
 0x2a2   : > { %v1195_v20 = vadd.f32 %v1194_v14, %v1193_v37  ;;  %v1244_v29 = vmax.f32 %v1242_v47, %v1243_v15  ;;  %v1206_v30 = vsel %vm3071_vm2, %v2716_v23, 0.0  ;;  %v1255_v2 = vsel %vm3071_vm2, %v2716_v23, -inf }
 0x2a3   : > { %v1207_v52 = vrot.slane %v1206_v30, 4  ;;  %v1256_v6 = vrot.slane %v1255_v2, 4  ;;  %v1250_v31 = vmax.f32 %v2712_v8, %v1200_v49  ;;  %v1201_v40 = vadd.f32 %v1200_v49, %v2712_v8 }
 0x2a4   : > { %v1245_v51 = vrot.slane %v1244_v29, 2  ;;  %v1196_v50 = vrot.slane %v1195_v20, 2  ;;  %v1232_v48 = vrot.slane %v1231_v44, 2  ;;  %v1182_v37 = vrot.slane %v1181_v45, 2 }
 0x2a5   : > { %v1208_v18 = vadd.f32 %v1207_v52, %v1206_v30  ;;  %v1257_v63 = vmax.f32 %v1255_v2, %v1256_v6  ;;  %v1251_v5 = vrot.slane %v1250_v31, 2  ;;  %v1202_v13 = vrot.slane %v1201_v40, 2 }
 0x2a6   : > { %v1246_v21 = vmax.f32 %v1244_v29, %v1245_v51  ;;  %v1197_v16 = vadd.f32 %v1196_v50, %v1195_v20  ;;  %v1187_v47 = vadd.f32 %v1186_v7, %v2663_v60  ;;  %v1237_v14 = vmax.f32 %v2663_v60, %v1186_v7 }
 0x2a7   : > { %v1252_v17 = vmax.f32 %v1250_v31, %v1251_v5  ;;  %v1203_v25 = vadd.f32 %v1202_v13, %v1201_v40  ;;  %v1209_v35 = vrot.slane %v1208_v18, 2  ;;  %v1258_v33 = vrot.slane %v1257_v63, 2 }
 0x2a8   : > { %v1247_v58 = vrot.slane %v1246_v21, 1  ;;  %v1198_v34 = vrot.slane %v1197_v16, 1  ;;  %v1233_v15 = vmax.f32 %v1231_v44, %v1232_v48  ;;  %v1183_v49 = vadd.f32 %v1182_v37, %v1181_v45 }
 0x2a9   : > { %v1253_v36 = vrot.slane %v1252_v17, 1  ;;  %v1204_v24 = vrot.slane %v1203_v25, 1  ;;  %v1210_v59 = vadd.f32 %v1209_v35, %v1208_v18  ;;  %v1259_v27 = vmax.f32 %v1257_v63, %v1258_v33 }
 0x2aa   : > { %v1248_v41 = vmax.f32 %v1246_v21, %v1247_v58  ;;  %v1199_v61 = vadd.f32 %v1198_v34, %v1197_v16  ;;  %v1188_v20 = vrot.slane %v1187_v47, 2  ;;  %v1238_v29 = vrot.slane %v1237_v14, 2 }
 0x2ab   : > { %v1254_v57 = vmax.f32 %v1252_v17, %v1253_v36  ;;  %v1205_v46 = vadd.f32 %v1204_v24, %v1203_v25  ;;  %v1211_v42 = vrot.slane %v1210_v59, 1  ;;  %v1260_v55 = vrot.slane %v1259_v27, 1 }
 0x2ac   : > { %1265 = vrot.lane.b32.xlu1 %v1248_v41, %s2176_s14  ;;  %1216 = vrot.lane.b32.xlu0 %v1199_v61, %s2176_s14  ;;  %v1234_v52 = vrot.slane %v1233_v15, 1  ;;  %v1184_v6 = vrot.slane %v1183_v49, 1  ;;  %v1189_v31 = vadd.f32 %v1188_v20, %v1187_v47  ;;  %v1239_v40 = vmax.f32 %v1237_v14, %v1238_v29  ;;  %v2775_v47 = vld [vmem:[#allocation2 + $0x20] sm:$0x3] }
 0x2ad   : > { %v1212_v39 = vadd.f32 %v1211_v42, %v1210_v59  ;;  %v1261_v10 = vmax.f32 %v1259_v27, %v1260_v55  ;;  %vm1425_vm2 = vcmask 7168  }
 0x2ae   : > { %v1235_v51 = vmax.f32 %v1233_v15, %v1234_v52  ;;  %v1185_v18 = vadd.f32 %v1184_v6, %v1183_v49  ;;  %v1190_v5 = vrot.slane %v1189_v31, 1  ;;  %v1240_v13 = vrot.slane %v1239_v40, 1  ;;  %v1588_v52 = vld [vmem:[%s3048_s6] sm:$0x3] }
 0x2b0   : > { %1267 = vrot.lane.b32.xlu0 %v1254_v57, %s2176_s14  ;;  %1218 = vrot.lane.b32.xlu1 %v1205_v46, %s2176_s14  ;;  %v1191_v58 = vadd.f32 %v1190_v5, %v1189_v31  ;;  %v1241_v36 = vmax.f32 %v1239_v40, %v1240_v13 }
 0x2b4   : > { %1220 = vrot.lane.b32.xlu0 %v1212_v39, %s2176_s14  ;;  %1269 = vrot.lane.b32.xlu1 %v1261_v10, %s2176_s14  ;;  %v1289_v39 = vld [vmem:[#allocation2 + $0x8] sm:$0x3] }
 0x2b8   : > { %1294 = vperm.xlu0 %2095, %v2734_v62   ;;  %1323 = vperm.xlu1 %2096, %v2734_v62  }
 0x2bc   : > { %2097 = vset.pattern.permute.xlu0 %v3075_v32  ;;  %2098 = vset.pattern.permute.xlu1 %v2159_v19 }
 0x2bd   : > { %1354 = vperm.xlu0 %2097, %v2734_v62   ;;  %1385 = vperm.xlu1 %2098, %v2734_v62  }
 0x2c1   : > { %2100 = vset.pattern.permute.xlu0 %v2143_v3  ;;  %2099 = vset.pattern.permute.xlu1 %v2166_v26 }
 0x2c2   : > { %1446 = vperm.xlu0 %2100, %v2734_v62   ;;  %1410 = vperm.xlu1 %2099, %v2734_v62  }
 0x2c6   : > { %2103 = vset.pattern.permute.xlu0 %v3076_v53  ;;  %2101 = vset.pattern.permute.xlu1 %v3077_v22 }
 0x2c7   : > { %1527 = vperm.xlu0 %2103, %v2734_v62   ;;  %1471 = vperm.xlu1 %2101, %v2734_v62  }
 0x2cb   : > { %2102 = vset.pattern.permute.xlu1 %v3078_v43  ;;  %2106 = vset.pattern.permute.xlu0 %v3073_v28 }
 0x2cc   : > { %1496 = vperm.xlu1 %2102, %v2734_v62  }
 0x2d0   : > { %2104 = vset.pattern.permute.xlu1 %v3079_v9 }
 0x2d1   : > { %1558 = vperm.xlu1 %2104, %v2734_v62  }
 0x2d5   : > { %2105 = vset.pattern.permute.xlu1 %v2141_v1 }
 0x31e   : > { %v1266_v30 = vpop.permute.xlu1 %1265  ;;  %v1217_v2 = vpop.permute.xlu0 %1216 }
 0x322   : > { %v1268_v50 = vpop.permute.xlu0 %1267  ;;  %v1219_v63 = vpop.permute.xlu1 %1218 }
 0x323   : > { %v1271_v21 = vsel %vm3066_vm5, %v1266_v30, %v1268_v50  ;;  %v1222_v16 = vsel %vm3066_vm5, %v1217_v2, %v1219_v63 }
 0x324   : > { %v1275_v17 = vmax.f32 %v1235_v51, %v1271_v21  ;;  %v1226_v25 = vadd.f32 %v1222_v16, %v1185_v18 }
 0x326   : > { %v1279_v35 = vrot.slane %v1275_v17, 7  ;;  %v1228_v33 = vmul.f32 0.0625, %v1226_v25  ;;  %v1221_v34 = vpop.permute.xlu0 %1220  ;;  %v1270_v24 = vpop.permute.xlu1 %1269 }
 0x327   : > { %v1223_v41 = vsel %vm3066_vm5, %v1219_v63, %v1221_v34  ;;  %v1272_v61 = vsel %vm3066_vm5, %v1268_v50, %v1270_v24  ;;  %vm1300_vm5 = vcmp.ge.s32.totalorder %v2633_v4, 5 }
 0x328   : > { %v1284_v59 = vsel %vm1283_vm14, %v1228_v33, %v1279_v35  ;;  %v1227_v27 = vadd.f32 %v1223_v41, %v1191_v58  ;;  %v1276_v57 = vmax.f32 %v1241_v36, %v1272_v61 }
 0x329   : > { %1286 = vst [vmem:[#allocation2 + $0x10] sm:$0x3] %v1284_v59 }
 0x32a   : > { %v1229_v46 = vmul.f32 0.0625, %v1227_v27  ;;  %v1280_v42 = vrot.slane %v1276_v57, 7 }
 0x32c   : > { %v1285_v55 = vsel %vm1283_vm14, %v1229_v46, %v1280_v42  ;;  %v2831_v42 = vld [vmem:[%s3049_s7] sm:$0x3]  ;;  %vm1344_vm14 = vcmask 31744  }
 0x32d   : > { %1287 = vst [vmem:[#allocation2 + $0x18] sm:$0x3] %v1285_v55 }
 0x330   : > { %v2791_v40 = vld [vmem:[#allocation2 + $0x10] sm:$0x3] }
 0x331   : > { %v1442_v13 = vld [vmem:[#allocation2 + $0x10] sm:$0x3] }
 0x334   : > { %v2809_v16 = vld [vmem:[#allocation2 + $0x18] sm:$0x3] }
 0x335   : > { %v1443_v36 = vld [vmem:[#allocation2 + $0x18] sm:$0x3] }
 0x337   : > { %v2766_v10 = vpop.permute.xlu0 %1294  ;;  %v1324_v11 = vpop.permute.xlu1 %1323 }
 0x338   : > { %v1297_v44 = vmul.f32 %v2766_v10, %v1289_v39  ;;  %v1326_v45 = vmul.f32 %v1324_v11, %v1289_v39  ;;  %v1327_v51 = vmul.f32 %v1324_v11, %v2791_v40  ;;  %v1298_v50 = vmul.f32 %v2766_v10, %v2791_v40 }
 0x339   : > { %v1328_v17 = vmul.f32 %v1324_v11, %v2809_v16  ;;  %v1299_v58 = vmul.f32 %v2766_v10, %v2809_v16 }
 0x33a   : > { %1309 = vrot.lane.b32.xlu1 %v1297_v44, %s2177_s22  ;;  %1338 = vrot.lane.b32.xlu0 %v1326_v45, %s2178_s23 }
 0x33c   : > { %v1355_v7 = vpop.permute.xlu0 %1354  ;;  %v2771_v48 = vpop.permute.xlu1 %1385 }
 0x33d   : > { %v1357_v37 = vmul.f32 %v1355_v7, %v1289_v39  ;;  %v1388_v14 = vmul.f32 %v2771_v48, %v1289_v39  ;;  %v1358_v18 = vmul.f32 %v1355_v7, %v2791_v40  ;;  %v1389_v63 = vmul.f32 %v2771_v48, %v2791_v40 }
 0x33e   : > { %1435 = vperm.xlu1 %2105, %v2734_v62   ;;  %v1359_v35 = vmul.f32 %v1355_v7, %v2809_v16  ;;  %v1390_v24 = vmul.f32 %v2771_v48, %v2809_v16 }
 0x33f   : > { %1369 = vrot.lane.b32.xlu0 %v1357_v37, %s2179_s24 }
 0x341   : > { %v1447_v15 = vpop.permute.xlu0 %1446  ;;  %v1411_v49 = vpop.permute.xlu1 %1410 }
 0x342   : > { %v1451_v20 = vmul.f32 %v1447_v15, %v2775_v47  ;;  %v1413_v29 = vmul.f32 %v1411_v49, %v1289_v39  ;;  %1394 = vrot.lane.b32.xlu1 %v1388_v14, %s2180_s26  ;;  %v1414_v5 = vmul.f32 %v1411_v49, %v2791_v40  ;;  %v1415_v34 = vmul.f32 %v1411_v49, %v2809_v16 }
 0x343   : > { %2108 = vset.pattern.permute.xlu1 %v3075_v32  ;;  %v1450_v41 = vmul.f32 %v1447_v15, %v1443_v36 }
 0x344   : > { %1419 = vrot.lane.b32.xlu0 %v1413_v29, %s2181_s27 }
 0x346   : > { %v1472_v62 = vpop.permute.xlu1 %1471  ;;  %1459 = vrot.lane.b32.xlu1 %v1451_v20, %s2182_s28  ;;  %v1528_v32 = vpop.permute.xlu0 %1527 }
 0x347   : > { %v1476_v30 = vmul.f32 %v1472_v62, %v2775_v47  ;;  %v1532_v31 = vmul.f32 %v1528_v32, %v2775_v47  ;;  %v1474_v21 = vmul.f32 %v1472_v62, %v1442_v13  ;;  %v1530_v33 = vmul.f32 %v1528_v32, %v1442_v13 }
 0x348   : > { %v1475_v57 = vmul.f32 %v1472_v62, %v1443_v36  ;;  %v1531_v55 = vmul.f32 %v1528_v32, %v1443_v36 }
 0x349   : > { %1484 = vrot.lane.b32.xlu0 %v1476_v30, %s2183_s29 }
 0x34b   : > { %v1497_v2 = vpop.permute.xlu1 %1496 }
 0x34c   : > { %v1501_v6 = vmul.f32 %v1497_v2, %v2775_v47  ;;  %v1499_v25 = vmul.f32 %v1497_v2, %v1442_v13  ;;  %v1500_v59 = vmul.f32 %v1497_v2, %v1443_v36 }
 0x34d   : > { %1591 = vperm.xlu0 %2106, %v1588_v52  }
 0x34e   : > { %1515 = vrot.lane.b32.xlu1 %v1501_v6, %s2184_s15 }
 0x350   : > { %v1559_v61 = vpop.permute.xlu1 %1558 }
 0x351   : > { %1546 = vrot.lane.b32.xlu0 %v1532_v31, %s2185_s21  ;;  %v1561_v27 = vmul.f32 %v1559_v61, %v1442_v13  ;;  %v1562_v46 = vmul.f32 %v1559_v61, %v1443_v36  ;;  %v1563_v39 = vmul.f32 %v1559_v61, %v2775_v47 }
 0x352   : > { %1340 = vrot.lane.b32.xlu1 %v1327_v51, %s2178_s23  ;;  %2107 = vset.pattern.permute.xlu0 %v3074_v12  ;;  %v1449_v12 = vmul.f32 %v1447_v15, %v1442_v13 }
 0x355   : > { %1311 = vrot.lane.b32.xlu0 %v1298_v50, %s2177_s22 }
 0x356   : > { %1371 = vrot.lane.b32.xlu1 %v1358_v18, %s2179_s24 }
 0x359   : > { %1396 = vrot.lane.b32.xlu0 %v1389_v63, %s2180_s26 }
 0x35a   : > { %1421 = vrot.lane.b32.xlu1 %v1414_v5, %s2181_s27 }
 0x35d   : > { %1480 = vrot.lane.b32.xlu0 %v1474_v21, %s2183_s29 }
 0x35e   : > { %1455 = vrot.lane.b32.xlu1 %v1449_v12, %s2182_s28 }
 0x361   : > { %1342 = vrot.lane.b32.xlu0 %v1328_v17, %s2178_s23  ;;  %s2186_s23 = smov 123  }
 0x362   : > { %1511 = vrot.lane.b32.xlu1 %v1499_v25, %s2184_s15 }
 0x365   : > { %1373 = vrot.lane.b32.xlu0 %v1359_v35, %s2179_s24 }
 0x366   : > { %1542 = vrot.lane.b32.xlu1 %v1530_v33, %s2185_s21 }
 0x369   : > { %1423 = vrot.lane.b32.xlu0 %v1415_v34, %s2181_s27 }
 0x36a   : > { %1313 = vrot.lane.b32.xlu1 %v1299_v58, %s2177_s22 }
 0x36d   : > { %1457 = vrot.lane.b32.xlu0 %v1450_v41, %s2182_s28 }
 0x36e   : > { %1398 = vrot.lane.b32.xlu1 %v1390_v24, %s2180_s26  ;;  %s2187_s26 = smov 48  }
 0x371   : > { %1513 = vrot.lane.b32.xlu0 %v1500_v59, %s2184_s15 }
 0x372   : > { %1573 = vrot.lane.b32.xlu1 %v1561_v27, %s2186_s23 }
 0x375   : > { %1575 = vrot.lane.b32.xlu0 %v1562_v46, %s2186_s23 }
 0x376   : > { %1482 = vrot.lane.b32.xlu1 %v1475_v57, %s2183_s29 }
 0x379   : > { %1611 = vperm.xlu0 %2107, %v2831_v42  }
 0x37a   : > { %1544 = vrot.lane.b32.xlu1 %v1531_v55, %s2185_s21 }
 0x37d   : > { %2110 = vset.pattern.permute.xlu0 %v2166_v26 }
 0x37e   : > { %1577 = vrot.lane.b32.xlu1 %v1563_v39, %s2186_s23  ;;  %1683 = vperm.xlu0 %2110, %v2831_v42  }
 0x382   : > { %1635 = vperm.xlu1 %2108, %v2831_v42   ;;  %2113 = vset.pattern.permute.xlu0 %v3077_v22 }
 0x383   : > { %1754 = vperm.xlu0 %2113, %v2831_v42  }
 0x386   : > { %2109 = vset.pattern.permute.xlu1 %v2159_v19 }
 0x387   : > { %1659 = vperm.xlu1 %2109, %v2831_v42   ;;  %2116 = vset.pattern.permute.xlu0 %v3078_v43 }
 0x38b   : > { %2111 = vset.pattern.permute.xlu1 %v2141_v1 }
 0x38c   : > { %1707 = vperm.xlu1 %2111, %v2831_v42  }
 0x390   : > { %2112 = vset.pattern.permute.xlu1 %v2143_v3 }
 0x391   : > { %1730 = vperm.xlu1 %2112, %v2831_v42  }
 0x395   : > { %2114 = vset.pattern.permute.xlu1 %v3076_v53 }
 0x396   : > { %1788 = vperm.xlu1 %2114, %v2831_v42  }
 0x39a   : > { %2115 = vset.pattern.permute.xlu1 %v3079_v9 }
 0x39b   : > { %1812 = vperm.xlu1 %2115, %v2831_v42  }
 0x3ac   : > { %v1339_v19 = vpop.permute.xlu0 %1338  ;;  %v1310_v26 = vpop.permute.xlu1 %1309 }
 0x3b1   : > { %v1370_v22 = vpop.permute.xlu0 %1369 }
 0x3b6   : > { %v1420_v10 = vpop.permute.xlu0 %1419 }
 0x3bb   : > { %v2856_v3 = vpop.permute.xlu0 %1484 }
 0x3bd   : > { %v2852_v43 = vpop.permute.xlu1 %1435 }
 0x3be   : > { %v1438_v39 = vmul.f32 %v2852_v43, %v2791_v40 }
 0x3c1   : > { %v1395_v1 = vpop.permute.xlu1 %1394 }
 0x3c5   : > { %v2854_v11 = vpop.permute.xlu1 %1459 }
 0x3c9   : > { %v2858_v44 = vpop.permute.xlu1 %1515 }
 0x3cc   : > { %v2860_v53 = vpop.permute.xlu0 %1591 }
 0x3cd   : > { %v1341_v45 = vpop.permute.xlu1 %1340 }
 0x3ce   : > { %v1345_v49 = vsel %vm1344_vm14, %v1339_v19, %v1341_v45 }
 0x3cf   : > { %v1349_v30 = vsel %vm1329_vm10, %v1345_v49, 0.0  ;;  %vm1301_vm10 = vcmp.ge.s32.totalorder %v2631_v56, 5 }
 0x3d0   : > { %v2862_v7 = vpop.permute.xlu0 %1546 }
 0x3d1   : > { %v1372_v9 = vpop.permute.xlu1 %1371 }
 0x3d2   : > { %v1376_v2 = vsel %vm1375_vm1, %v1370_v22, %v1372_v9 }
 0x3d3   : > { %v1380_v51 = vsel %vm1360_vm3, %v1376_v2, 0.0  ;;  %vm1502_vm3 = vcmp.lt.s32.totalorder %v2633_v4, 13 }
 0x3d4   : > { %v1312_v48 = vpop.permute.xlu0 %1311 }
 0x3d5   : > { %v1422_v37 = vpop.permute.xlu1 %1421  ;;  %v1316_v47 = vsel %vm1315_vm11, %v1310_v26, %v1312_v48 }
 0x3d6   : > { %v1320_v20 = vsel %vm1300_vm5, %v1316_v47, 0.0  ;;  %vm1330_vm5 = vcmp.ge.s32.totalorder %v2631_v56, 4  ;;  %v1426_v17 = vsel %vm1425_vm2, %v1420_v10, %v1422_v37 }
 0x3d7   : > { %v1351_v52 = vadd.f32 %v1349_v30, %v1320_v20  ;;  %v1430_v41 = vsel %vm608_vm8, %v1426_v17, 0.0  ;;  %vm1548_vm8 = vcmask 1014784  }
 0x3d8   : > { %v1397_v14 = vpop.permute.xlu0 %1396 }
 0x3d9   : > { %v1456_v15 = vpop.permute.xlu1 %1455  ;;  %v1401_v6 = vsel %vm1400_vm0, %v1395_v1, %v1397_v14  ;;  %v1382_v50 = vadd.f32 %v1380_v51, %v1351_v52  ;;  %v1439_v1 = vmul.f32 %v2852_v43, %v2809_v16 }
 0x3da   : > { %v1405_v18 = vsel %vm483_vm9, %v1401_v6, 0.0  ;;  %vm3080_vm9 = vcmp.lt.s32.totalorder %v2631_v56, 14 }
 0x3db   : > { %v1407_v25 = vadd.f32 %v1405_v18, %v1382_v50 }
 0x3dc   : > { %v1481_v29 = vpop.permute.xlu0 %1480 }
 0x3dd   : > { %v1512_v62 = vpop.permute.xlu1 %1511  ;;  %v1432_v57 = vadd.f32 %v1430_v41, %v1407_v25 }
 0x3e0   : > { %v1343_v32 = vpop.permute.xlu0 %1342 }
 0x3e1   : > { %v2871_v31 = vpop.permute.xlu1 %1542  ;;  %v1346_v63 = vsel %vm1344_vm14, %v1341_v45, %v1343_v32  ;;  %vm3082_vm14 = vcmask 785408  }
 0x3e2   : > { %v1350_v35 = vsel %vm1330_vm5, %v1346_v63, 0.0  ;;  %vm3083_vm5 = vcmask 654336  }
 0x3e4   : > { %v1374_v5 = vpop.permute.xlu0 %1373 }
 0x3e5   : > { %v1314_v13 = vpop.permute.xlu1 %1313  ;;  %v1377_v12 = vsel %vm1375_vm1, %v1372_v9, %v1374_v5  ;;  %vm1461_vm1 = vcmask 1039360  }
 0x3e6   : > { %v1317_v21 = vsel %vm1315_vm11, %v1312_v48, %v1314_v13  ;;  %v1381_v34 = vsel %vm1361_vm4, %v1377_v12, 0.0  ;;  %v1440_v48 = vadd.f32 %v1438_v39, %v1432_v57  ;;  %vm1564_vm4 = vcmp.lt.s32.totalorder %v2633_v4, 11  ;;  %v2928_v57 = vld [vmem:[#allocation2 + $0x20] sm:$0x3] }
 0x3e7   : > { %v1321_v33 = vsel %vm1301_vm10, %v1317_v21, 0.0  ;;  %v2917_v21 = vld [vmem:[#allocation2 + $0x8] sm:$0x3]  ;;  %vm3081_vm11 = vcmask 916480   ;;  %vm3084_vm10 = vcmask 523264  }
 0x3e8   : > { %v1352_v58 = vadd.f32 %v1350_v35, %v1321_v33  ;;  %v1424_v36 = vpop.permute.xlu0 %1423 }
 0x3e9   : > { %v1399_v24 = vpop.permute.xlu1 %1398  ;;  %v1427_v61 = vsel %vm1425_vm2, %v1422_v37, %v1424_v36  ;;  %vm1486_vm2 = vcmask 1031168  }
 0x3ea   : > { %v1383_v59 = vadd.f32 %v1381_v34, %v1352_v58  ;;  %v1402_v27 = vsel %vm1400_vm0, %v1397_v14, %v1399_v24  ;;  %v1431_v19 = vsel %vm609_vm6, %v1427_v61, 0.0  ;;  %vm1517_vm0 = vcmask 1022976  }
 0x3eb   : > { %v1406_v46 = vsel %vm484_vm7, %v1402_v27, 0.0  ;;  %vm1503_vm6 = vcmp.lt.s32.totalorder %v2631_v56, 13  ;;  %vm1579_vm7 = vcmask 1006592  }
 0x3ec   : > { %v1408_v55 = vadd.f32 %v1406_v46, %v1383_v59  ;;  %v1458_v26 = vpop.permute.xlu0 %1457 }
 0x3ed   : > { %v1574_v22 = vpop.permute.xlu1 %1573  ;;  %v1462_v45 = vsel %vm1461_vm1, %v1456_v15, %v1458_v26  ;;  %v1463_v9 = vsel %vm1461_vm1, %v1458_v26, %v2854_v11  ;;  %vm3085_vm1 = vmmov %vm3081_vm11 }
 0x3ee   : > { %v1433_v10 = vadd.f32 %v1431_v19, %v1408_v55  ;;  %v1466_v37 = vsel %vm849_vm12, %v1462_v45, 0.0  ;;  %v1467_v40 = vsel %vm850_vm13, %v1463_v9, 0.0  ;;  %vm1533_vm12 = vcmp.lt.s32.totalorder %v2633_v4, 12 }
 0x3ef   : > { %v1468_v14 = vadd.f32 %v1466_v37, %v1440_v48  ;;  %vm1534_vm13 = vcmp.lt.s32.totalorder %v2631_v56, 12 }
 0x3f0   : > { %v1441_v47 = vadd.f32 %v1439_v1, %v1433_v10  ;;  %v1514_v16 = vpop.permute.xlu0 %1513 }
 0x3f1   : > { %v1483_v43 = vpop.permute.xlu1 %1482  ;;  %v1518_v49 = vsel %vm1517_vm0, %v1512_v62, %v1514_v16  ;;  %v1519_v11 = vsel %vm1517_vm0, %v1514_v16, %v2858_v44  ;;  %vm3086_vm0 = vmmov %vm3082_vm14 }
 0x3f2   : > { %v1469_v15 = vadd.f32 %v1467_v40, %v1441_v47  ;;  %v1487_v20 = vsel %vm1486_vm2, %v1481_v29, %v1483_v43  ;;  %v1488_v30 = vsel %vm1486_vm2, %v1483_v43, %v2856_v3  ;;  %v1522_v62 = vsel %vm1502_vm3, %v1518_v49, 0.0  ;;  %vm3087_vm2 = vmmov %vm3083_vm5 }
 0x3f3   : > { %v1491_v2 = vsel %vm976_vm15, %v1487_v20, 0.0  ;;  %v1492_v52 = vsel %vm3080_vm9, %v1488_v30, 0.0  ;;  %v1523_v44 = vsel %vm1503_vm6, %v1519_v11, 0.0  ;;  %vm1565_vm15 = vcmp.lt.s32.totalorder %v2631_v56, 11  ;;  %v1835_v30 = vld [vmem:[%s3050_s8] sm:$0x3]  ;;  %vm3088_vm6 = vmmov %vm3084_vm10 }
 0x3f4   : > { %v1493_v6 = vadd.f32 %v1491_v2, %v1468_v14  ;;  %v1494_v3 = vadd.f32 %v1492_v52, %v1469_v15  ;;  %v1576_v29 = vpop.permute.xlu0 %1575  ;;  %vm1718_vm3 = vcmask 392192   ;;  %vm3091_vm9 = vcmask 130048  }
 0x3f5   : > { %v1545_v32 = vpop.permute.xlu1 %1544  ;;  %v1580_v51 = vsel %vm1579_vm7, %v1574_v22, %v1576_v29 }
 0x3f6   : > { %v1524_v50 = vadd.f32 %v1522_v62, %v1493_v6  ;;  %v1549_v18 = vsel %vm1548_vm8, %v2871_v31, %v1545_v32  ;;  %v1550_v63 = vsel %vm1548_vm8, %v1545_v32, %v2862_v7  ;;  %v1525_v5 = vadd.f32 %v1523_v44, %v1494_v3 }
 0x3f7   : > { %v1553_v13 = vsel %vm1533_vm12, %v1549_v18, 0.0  ;;  %v1554_v12 = vsel %vm1534_vm13, %v1550_v63, 0.0  ;;  %v1584_v25 = vsel %vm1564_vm4, %v1580_v51, 0.0  ;;  %vm3092_vm12 = vmmov %vm3091_vm9 }
 0x3f8   : > { %v1555_v17 = vadd.f32 %v1553_v13, %v1524_v50  ;;  %v1612_v4 = vpop.permute.xlu0 %1611  ;;  %v1556_v33 = vadd.f32 %v1554_v12, %v1525_v5  ;;  %vm3093_vm13 = vmmov %vm3085_vm1 }
 0x3f9   : > { %v1578_v35 = vpop.permute.xlu1 %1577  ;;  %v1614_v36 = vmul.f32 %v1612_v4, %v2917_v21  ;;  %vm3094_vm4 = vmmov %vm3085_vm1 }
 0x3fa   : > { %v1586_v58 = vadd.f32 %v1584_v25, %v1555_v17  ;;  %v1581_v34 = vsel %vm1579_vm7, %v1576_v29, %v1578_v35  ;;  %vm3089_vm7 = vcmask 261120  }
 0x3fb   : > { %v1585_v31 = vsel %vm1565_vm15, %v1581_v34, 0.0  ;;  %1620 = vrot.lane.b32.xlu1 %v1614_v36, %s2167_s17  ;;  %vm3090_vm8 = vmmov %vm3089_vm7 }
 0x3fc   : > { %v1594_v7 = vadd.f32 %v2860_v53, %v1586_v58  ;;  %v1587_v24 = vadd.f32 %v1585_v31, %v1556_v33  ;;  %vm3095_vm15 = vmmov %vm3086_vm0 }
 0x3fd   : > { %v1684_v56 = vpop.permute.xlu0 %1683 }
 0x3fe   : > { %1596 = vst [vmem:[#allocation2 + $0x10] sm:$0x3] %v1594_v7  ;;  %v1595_v41 = vadd.f32 %v2860_v53, %v1587_v24  ;;  %v1686_v27 = vmul.f32 %v1684_v56, %v2917_v21 }
 0x400   : > { %1597 = vst [vmem:[#allocation2 + $0x18] sm:$0x3] %v1595_v41 }
 0x401   : > { %v1636_v61 = vpop.permute.xlu1 %1635 }
 0x402   : > { %v1638_v59 = vmul.f32 %v1636_v61, %v2917_v21  ;;  %v1755_v55 = vpop.permute.xlu0 %1754 }
 0x403   : > { %v1759_v19 = vmul.f32 %v1755_v55, %v2928_v57 }
 0x404   : > { %1644 = vrot.lane.b32.xlu1 %v1638_v59, %s2168_s18 }
 0x405   : > { %v2934_v53 = vld [vmem:[#allocation2 + $0x10] sm:$0x3] }
 0x406   : > { %v1660_v46 = vpop.permute.xlu1 %1659  ;;  %v1615_v22 = vmul.f32 %v1612_v4, %v2934_v53  ;;  %v2947_v48 = vld [vmem:[#allocation2 + $0x10] sm:$0x3]  ;;  %v1639_v37 = vmul.f32 %v1636_v61, %v2934_v53 }
 0x407   : > { %v1662_v39 = vmul.f32 %v1660_v46, %v2917_v21  ;;  %v1663_v10 = vmul.f32 %v1660_v46, %v2934_v53  ;;  %v2952_v47 = vld [vmem:[#allocation2 + $0x18] sm:$0x3] }
 0x408   : > { %1692 = vrot.lane.b32.xlu1 %v1686_v27, %s2170_s20  ;;  %v1640_v40 = vmul.f32 %v1636_v61, %v2952_v47  ;;  %v1616_v15 = vmul.f32 %v1612_v4, %v2952_v47  ;;  %v1688_v49 = vmul.f32 %v1684_v56, %v2952_v47  ;;  %v1664_v11 = vmul.f32 %v1660_v46, %v2952_v47  ;;  %v2973_v2 = vld [vmem:[#allocation2 + $0x18] sm:$0x3] }
 0x409   : > { %1668 = vrot.lane.b32.xlu0 %v1662_v39, %s2169_s19  ;;  %v1758_v62 = vmul.f32 %v1755_v55, %v2973_v2 }
 0x40b   : > { %v1708_v26 = vpop.permute.xlu1 %1707 }
 0x40c   : > { %1767 = vrot.lane.b32.xlu1 %v1759_v19, %s2176_s14  ;;  %v1710_v9 = vmul.f32 %v1708_v26, %v2934_v53  ;;  %v1711_v20 = vmul.f32 %v1708_v26, %v2952_v47 }
 0x40d   : > { %1778 = vperm.xlu0 %2116, %v2831_v42  }
 0x410   : > { %1622 = vrot.lane.b32.xlu1 %v1615_v22, %s2167_s17  ;;  %v1731_v1 = vpop.permute.xlu1 %1730 }
 0x411   : > { %2117 = vset.pattern.permute.xlu0 %v3073_v28  ;;  %v1735_v45 = vmul.f32 %v1731_v1, %v2928_v57  ;;  %v1757_v28 = vmul.f32 %v1755_v55, %v2947_v48  ;;  %v1733_v16 = vmul.f32 %v1731_v1, %v2947_v48  ;;  %v1734_v52 = vmul.f32 %v1731_v1, %v2973_v2 }
 0x412   : > { %1604 = vperm.xlu0 %2117, %v2831_v42   ;;  %v1687_v42 = vmul.f32 %v1684_v56, %v2934_v53 }
 0x414   : > { %1670 = vrot.lane.b32.xlu1 %v1663_v10, %s2169_s19 }
 0x415   : > { %v1789_v14 = vpop.permute.xlu1 %1788 }
 0x416   : > { %1743 = vrot.lane.b32.xlu0 %v1735_v45, %s2173_s25  ;;  %v1791_v43 = vmul.f32 %v1789_v14, %v2947_v48  ;;  %v1793_v3 = vmul.f32 %v1789_v14, %v2928_v57  ;;  %v1792_v29 = vmul.f32 %v1789_v14, %v2973_v2 }
 0x418   : > { %1714 = vrot.lane.b32.xlu1 %v1710_v9, %s2187_s26 }
 0x41a   : > { %1646 = vrot.lane.b32.xlu0 %v1639_v37, %s2168_s18  ;;  %v1813_v6 = vpop.permute.xlu1 %1812 }
 0x41b   : > { %v1815_v44 = vmul.f32 %v1813_v6, %v2947_v48  ;;  %v1816_v32 = vmul.f32 %v1813_v6, %v2973_v2  ;;  %v1817_v51 = vmul.f32 %v1813_v6, %v2928_v57 }
 0x41c   : > { %1763 = vrot.lane.b32.xlu1 %v1757_v28, %s2176_s14 }
 0x41e   : > { %1694 = vrot.lane.b32.xlu0 %v1687_v42, %s2170_s20 }
 0x420   : > { %1648 = vrot.lane.b32.xlu1 %v1640_v40, %s2168_s18 }
 0x422   : > { %1739 = vrot.lane.b32.xlu0 %v1733_v16, %s2173_s25 }
 0x424   : > { %1797 = vrot.lane.b32.xlu1 %v1791_v43, %s2167_s17 }
 0x426   : > { %1624 = vrot.lane.b32.xlu0 %v1616_v15, %s2167_s17 }
 0x428   : > { %1696 = vrot.lane.b32.xlu1 %v1688_v49, %s2170_s20 }
 0x42a   : > { %1672 = vrot.lane.b32.xlu0 %v1664_v11, %s2169_s19 }
 0x42c   : > { %1716 = vrot.lane.b32.xlu1 %v1711_v20, %s2187_s26 }
 0x42e   : > { %1838 = vperm.xlu0 %2117, %v1835_v30  }
 0x430   : > { %1741 = vrot.lane.b32.xlu1 %v1734_v52, %s2173_s25 }
 0x432   : > { %1765 = vrot.lane.b32.xlu0 %v1758_v62, %s2176_s14 }
 0x434   : > { %1821 = vrot.lane.b32.xlu1 %v1815_v44, %s2168_s18 }
 0x436   : > { %1801 = vrot.lane.b32.xlu0 %v1793_v3, %s2167_s17 }
 0x438   : > { %1799 = vrot.lane.b32.xlu1 %v1792_v29, %s2167_s17 }
 0x43a   : > { %1823 = vrot.lane.b32.xlu0 %v1816_v32, %s2168_s18 }
 0x43c   : > { %1825 = vrot.lane.b32.xlu1 %v1817_v51, %s2168_s18 }
 0x46d   : > { %v1621_v50 = vpop.permute.xlu1 %1620 }
 0x476   : > { %v1645_v18 = vpop.permute.xlu1 %1644 }
 0x47a   : > { %v1693_v63 = vpop.permute.xlu1 %1692 }
 0x47b   : > { %v1669_v17 = vpop.permute.xlu0 %1668 }
 0x47e   : > { %v1768_v5 = vpop.permute.xlu1 %1767 }
 0x482   : > { %v1623_v13 = vpop.permute.xlu1 %1622 }
 0x483   : > { %v1626_v41 = vsel %vm3081_vm11, %v1621_v50, %v1623_v13  ;;  %vm3096_vm11 = vmmov %vm3086_vm0 }
 0x486   : > { %v1671_v12 = vpop.permute.xlu1 %1670 }
 0x487   : > { %v1674_v39 = vsel %vm3083_vm5, %v1669_v17, %v1671_v12  ;;  %vm3098_vm5 = vmmov %vm3088_vm6 }
 0x48a   : > { %v1715_v25 = vpop.permute.xlu1 %1714 }
 0x48c   : > { %v1779_v35 = vpop.permute.xlu0 %1778 }
 0x48d   : > { %v1783_v17 = vmul.f32 %v1779_v35, %v2928_v57 }
 0x48e   : > { %v1764_v4 = vpop.permute.xlu1 %1763 }
 0x491   : > { %v1605_v33 = vpop.permute.xlu0 %1604 }
 0x492   : > { %v1649_v58 = vpop.permute.xlu1 %1648  ;;  %v1607_v31 = vmul.f32 %v1605_v33, %v2917_v21  ;;  %v1609_v26 = vmul.f32 %v1605_v33, %v2952_v47  ;;  %v1608_v21 = vmul.f32 %v1605_v33, %v2934_v53 }
 0x494   : > { %v1631_v61 = vadd.f32 %v1626_v41, %v1607_v31 }
 0x495   : > { %v1744_v34 = vpop.permute.xlu0 %1743 }
 0x496   : > { %v1798_v36 = vpop.permute.xlu1 %1797 }
 0x499   : > { %v1647_v7 = vpop.permute.xlu0 %1646 }
 0x49a   : > { %v1697_v24 = vpop.permute.xlu1 %1696  ;;  %v1650_v56 = vsel %vm3082_vm14, %v1645_v18, %v1647_v7  ;;  %v1651_v42 = vsel %vm3086_vm0, %v1647_v7, %v1649_v58  ;;  %vm3097_vm14 = vmmov %vm3088_vm6 }
 0x49b   : > { %v1655_v27 = vadd.f32 %v1650_v56, %v1631_v61  ;;  %vm3101_vm0 = vmmov %vm3091_vm9 }
 0x49d   : > { %v1695_v59 = vpop.permute.xlu0 %1694  ;;  %v1679_v19 = vadd.f32 %v1674_v39, %v1655_v27 }
 0x49e   : > { %v1717_v46 = vpop.permute.xlu1 %1716  ;;  %v1698_v22 = vsel %vm3084_vm10, %v1693_v63, %v1695_v59  ;;  %v1699_v53 = vsel %vm3088_vm6, %v1695_v59, %v1697_v24  ;;  %v1782_v63 = vmul.f32 %v1779_v35, %v2973_v2  ;;  %vm3099_vm10 = vmmov %vm3087_vm2 }
 0x49f   : > { %v1703_v9 = vadd.f32 %v1698_v22, %v1679_v19  ;;  %v1719_v6 = vsel %vm1718_vm3, %v1715_v25, %v1717_v46 }
 0x4a1   : > { %v1740_v55 = vpop.permute.xlu0 %1739  ;;  %v1723_v47 = vadd.f32 %v1715_v25, %v1703_v9 }
 0x4a2   : > { %v1742_v37 = vpop.permute.xlu1 %1741 }
 0x4a3   : > { %v1750_v44 = vadd.f32 %v1740_v55, %v1723_v47  ;;  %v1746_v3 = vsel %vm3089_vm7, %v1742_v37, %v1744_v34  ;;  %v1745_v32 = vsel %vm3090_vm8, %v1740_v55, %v1742_v37  ;;  %v1781_v34 = vmul.f32 %v1779_v35, %v2947_v48 }
 0x4a5   : > { %v1625_v1 = vpop.permute.xlu0 %1624  ;;  %v1774_v33 = vadd.f32 %v1764_v4, %v1750_v44 }
 0x4a6   : > { %v1627_v10 = vsel %vm3085_vm1, %v1623_v13, %v1625_v1  ;;  %v1633_v45 = vadd.f32 %v1625_v1, %v1609_v26  ;;  %v1822_v20 = vpop.permute.xlu1 %1821  ;;  %vm3100_vm1 = vmmov %vm3087_vm2 }
 0x4a7   : > { %v1632_v28 = vadd.f32 %v1627_v10, %v1608_v21  ;;  %v1784_v2 = vadd.f32 %v1781_v34, %v1774_v33 }
 0x4a8   : > { %v1657_v40 = vadd.f32 %v1649_v58, %v1633_v45 }
 0x4a9   : > { %v1673_v14 = vpop.permute.xlu0 %1672  ;;  %v1656_v16 = vadd.f32 %v1651_v42, %v1632_v28 }
 0x4aa   : > { %v1675_v43 = vsel %vm3087_vm2, %v1671_v12, %v1673_v14  ;;  %v1681_v15 = vadd.f32 %v1673_v14, %v1657_v40  ;;  %v1800_v25 = vpop.permute.xlu1 %1799  ;;  %v1863_v40 = vshrl.u32 %v333_v38, 7  ;;  %vm3102_vm2 = vmmov %vm3101_vm0 }
 0x4ab   : > { %v1680_v49 = vadd.f32 %v1675_v43, %v1656_v16  ;;  %v1803_v56 = vsel %vm3093_vm13, %v1798_v36, %v1800_v25 }
 0x4ac   : > { %v1705_v11 = vadd.f32 %v1697_v24, %v1681_v15  ;;  %v1891_v14 = vsub.s32 1, %v1863_v40 }
 0x4ad   : > { %v1704_v30 = vadd.f32 %v1699_v53, %v1680_v49  ;;  %v1839_v52 = vpop.permute.xlu0 %1838  ;;  %v1864_v53 = vsub.s32 0, %v1863_v40 }
 0x4ae   : > { %v1725_v62 = vadd.f32 %v1717_v46, %v1705_v11  ;;  %v1826_v27 = vpop.permute.xlu1 %1825  ;;  %v1808_v46 = vadd.f32 %v1803_v56, %v1784_v2 }
 0x4af   : > { %v1724_v29 = vadd.f32 %v1719_v6, %v1704_v30 }
 0x4b0   : > { %v1752_v51 = vadd.f32 %v1746_v3, %v1725_v62 }
 0x4b1   : > { %v1766_v50 = vpop.permute.xlu0 %1765  ;;  %v1751_v18 = vadd.f32 %v1745_v32, %v1724_v29 }
 0x4b2   : > { %v1769_v13 = vsel %vm3091_vm9, %v1764_v4, %v1766_v50  ;;  %v1770_v12 = vsel %vm3092_vm12, %v1766_v50, %v1768_v5 }
 0x4b3   : > { %v1775_v58 = vadd.f32 %v1769_v13, %v1751_v18  ;;  %v1776_v31 = vadd.f32 %v1770_v12, %v1752_v51 }
 0x4b5   : > { %v1802_v7 = vpop.permute.xlu0 %1801  ;;  %v1785_v24 = vadd.f32 %v1782_v63, %v1775_v58  ;;  %v1786_v41 = vadd.f32 %v1783_v17, %v1776_v31  ;;  %v2131_v31 = vld [vmem:[%s2301_s16] sm:$0xff] }
 0x4b6   : > { %v1804_v61 = vsel %vm3094_vm4, %v1800_v25, %v1802_v7 }
 0x4b7   : > { %v1810_v59 = vadd.f32 %v1802_v7, %v1786_v41  ;;  %v1809_v5 = vadd.f32 %v1804_v61, %v1785_v24  ;;  %v2132_v41 = vld [vmem:[%s2301_s16 + $0x8] sm:$0xff] }
 0x4b9   : > { %v1834_v55 = vadd.f32 %v1826_v27, %v1810_v59  ;;  %v1824_v57 = vpop.permute.xlu0 %1823 }
 0x4ba   : > { %v1827_v4 = vsel %vm3095_vm15, %v1822_v20, %v1824_v57  ;;  %v1828_v39 = vsel %vm3096_vm11, %v1824_v57, %v1826_v27 }
 0x4bb   : > { %v1843_v19 = vadd.f32 %v1839_v52, %v1834_v55  ;;  %v1832_v48 = vadd.f32 %v1827_v4, %v1808_v46  ;;  %v1833_v35 = vadd.f32 %v1828_v39, %v1809_v5 }
 0x4bd   : > { %v2003_v26 = vmul.f32 -1.442695, %v1843_v19  ;;  %v1841_v22 = vadd.f32 %v1839_v52, %v1832_v48  ;;  %v1842_v21 = vadd.f32 %v1839_v52, %v1833_v35 }
 0x4bf   : > { %2118 = vpow2.f32 %v2003_v26  ;;  %v2001_v36 = vmul.f32 -1.442695, %v1841_v22  ;;  %v2002_v1 = vmul.f32 -1.442695, %v1842_v21 }
 0x4c1   : > { %2120 = vpow2.f32 %v2001_v36 }
 0x4c2   : > { %2122 = vpow2.f32 %v2002_v1 }
 0x4c9   : > { %v2119_v10 = vpop.eup %2118 }
 0x4ca   : > { %v1855_v37 = vadd.f32 1.0, %v2119_v10 }
 0x4cb   : > { %v2121_v45 = vpop.eup %2120 }
 0x4cc   : > { %v2123_v9 = vpop.eup %2122  ;;  %v1853_v28 = vadd.f32 1.0, %v2121_v45 }
 0x4cd   : > { %v1854_v42 = vadd.f32 1.0, %v2123_v9 }
 0x4ce   : > { %2124 = vrcp.f32 %v1853_v28 }
 0x4cf   : > { %2126 = vrcp.f32 %v1854_v42 }
 0x4d0   : > { %2128 = vrcp.f32 %v1855_v37 }
 0x4d8   : > { %v2125_v16 = vpop.eup %2124 }
 0x4d9   : > { %v2127_v43 = vpop.eup %2126  ;;  %v1892_v15 = vrot.slane %v2125_v16, %v1891_v14  ;;  %v1865_v20 = vrot.slane %v2125_v16, %v1864_v53 }
 0x4da   : > { %v2129_v47 = vpop.eup %2128  ;;  %v1896_v49 = vrot.slane %v2127_v43, %v1891_v14  ;;  %v1869_v30 = vrot.slane %v2127_v43, %v1864_v53 }
 0x4db   : > { %1904 = vrot.lane.b32.xlu0 %v1892_v15, %s2170_s20  ;;  %v1900_v11 = vrot.slane %v2129_v47, %v1891_v14  ;;  %v1873_v52 = vrot.slane %v2129_v47, %v1864_v53 }
 0x4dc   : > { %1906 = vrot.lane.b32.xlu1 %v1896_v49, %s2170_s20 }
 0x4df   : > { %1908 = vrot.lane.b32.xlu0 %v1900_v11, %s2170_s20 }
 0x4e0   : > { %1877 = vrot.lane.b32.xlu1 %v1865_v20, %s2169_s19 }
 0x4e3   : > { %1879 = vrot.lane.b32.xlu0 %v1869_v30, %s2169_s19 }
 0x4e4   : > { %1881 = vrot.lane.b32.xlu1 %v1873_v52, %s2169_s19  ;;  %s332_s19 = scalar_lea.vmem %s3051_s9, %s2006_s13 }
 0x54d   : > { %v1905_v38 = vpop.permute.xlu0 %1904 }
 0x54e   : > { %v1915_v6 = vmul.f32 %v1905_v38, %v2709_v0  ;;  %v1907_v62 = vpop.permute.xlu1 %1906 }
 0x54f   : > { %v1910_v44 = vsel %vm3097_vm14, %v1905_v38, %v1907_v62 }
 0x550   : > { %v1916_v3 = vmul.f32 %v1910_v44, %v2712_v8  ;;  %1921 = vrot.lane.b32.xlu0 %v1915_v6, %s2176_s14 }
 0x551   : > { %v1909_v29 = vpop.permute.xlu0 %1908 }
 0x552   : > { %v1911_v32 = vsel %vm3098_vm5, %v1907_v62, %v1909_v29  ;;  %1923 = vrot.lane.b32.xlu1 %v1916_v3, %s2176_s14  ;;  %v1878_v50 = vpop.permute.xlu1 %1877 }
 0x553   : > { %v1917_v51 = vmul.f32 %v1911_v32, %v2716_v23 }
 0x555   : > { %1925 = vrot.lane.b32.xlu0 %v1917_v51, %s2176_s14  ;;  %v1880_v0 = vpop.permute.xlu0 %1879 }
 0x556   : > { %v1882_v18 = vpop.permute.xlu1 %1881  ;;  %v1883_v63 = vsel %vm3099_vm10, %v1878_v50, %v1880_v0 }
 0x557   : > { %v1884_v13 = vsel %vm3100_vm1, %v1880_v0, %v1882_v18  ;;  %v1887_v12 = vmul.f32 %v1883_v63, %v2661_v54 }
 0x558   : > { %v1888_v58 = vmul.f32 %v1884_v13, %v2663_v60 }
 0x5c2   : > { %v1922_v8 = vpop.permute.xlu0 %1921 }
 0x5c4   : > { %v1924_v17 = vpop.permute.xlu1 %1923 }
 0x5c5   : > { %v1927_v33 = vsel %vm3101_vm0, %v1922_v8, %v1924_v17 }
 0x5c6   : > { %v1931_v25 = vadd.f32 %v1927_v33, %v1887_v12 }
 0x5c7   : > { %v1926_v23 = vpop.permute.xlu0 %1925 }
 0x5c8   : > { %v1933_v34 = vadd.f32 %v2131_v31, %v1931_v25  ;;  %v1928_v7 = vsel %vm3102_vm2, %v1924_v17, %v1926_v23 }
 0x5c9   : > { %v1932_v24 = vadd.f32 %v1928_v7, %v1888_v58 }
 0x5ca   : > { %1935 = vst [vmem:[%s332_s19] sm:$0xff] %v1933_v34 }
 0x5cb   : > { %v1934_v54 = vadd.f32 %v2132_v41, %v1932_v24 }
 0x5cd   : > { %1936 = vst [vmem:[%s332_s19 + $0x8] sm:$0xff] %v1934_v54 }
 0x5ce PF: > { %s19_s30 = sadd.s32 1, %s2139_s30  }
 0x5cf   : > { %p16_p4 = scmp.ge.s32.totalorder %s19_s30, 4  }
 0x5d1   :  { %18 = sbr.rel (!%p16_p4) target bundleno = 1 (0x1), region = 86 }

</bundles_post_ra>
